<compile_context>
chip_gen: v7x
topology: tpu7x:2x2x1
jax: 0.10.0
libtpu: 0.0.40
codegen_flags: <defaults>
</compile_context>

<pallas_src>
import functools

import jax
import jax.numpy as jnp
from jax import lax
from jax.experimental import pallas as pl
from jax.experimental.pallas import tpu as pltpu


def _mil_nce_kernel(v_ref, tT_ref, cid_ref,
                    loss_ref, r1_ref, r5_ref, r10_ref, rk_ref,
                    s_scr, *, temperature, T):
    """Grid axis 0 streams column tiles of the (pre-transposed) text matrix."""
    j = pl.program_id(0)
    n_tiles = pl.num_programs(0)
    inv_temp = jnp.float32(1.0 / temperature)

    # MXU: bf16 x bf16 -> f32 accumulate; RHS already [D, tile_nt].
    s_tile = jnp.dot(v_ref[...], tT_ref[...],
                     preferred_element_type=jnp.float32) * inv_temp
    s_scr[j] = s_tile                                   # dynamic leading index

    @pl.when(j == n_tiles - 1)
    def _epilogue():
        s = s_scr[...]                                  # [G, N, C] f32
        G, N, C = s.shape
        NEG = jnp.float32(-1e30)

        # Positive-pair mask via range compare (no s32 division).
        # cid_ref holds the global column index of every (tile, lane) slot.
        row = lax.broadcasted_iota(jnp.int32, (G, N, C), 1)     # video index
        cidx = cid_ref[...]                                      # [G, 1, C]
        lo = row * T
        mask = (cidx >= lo) & (cidx < lo + T)                    # [G, N, C]

        def red_nt(x, op):          # reduce over the NT axes (lane, then tile)
            return op(op(x, axis=2, keepdims=True), axis=0, keepdims=True)

        # ---- shared row statistics: a single full-size exp ----
        row_max = red_nt(s, jnp.max)                             # [1, N, 1]
        p = jnp.exp(s - row_max)                                 # exp #1
        row_sum = red_nt(p, jnp.sum)                             # [1, N, 1]

        # nominator: logsumexp over the T positive entries of each row.
        nom_lse = row_max + jnp.log(
            red_nt(jnp.where(mask, p, 0.0), jnp.sum))            # [1, N, 1]

        # per-column logsumexp over rows, reusing p (no extra full-size exp).
        g_max = jnp.max(row_max, axis=1, keepdims=True)          # [1, 1, 1]
        col_sum = jnp.sum(p * jnp.exp(row_max - g_max),
                          axis=1, keepdims=True)                 # [G, 1, C]
        col_lse = g_max + jnp.log(col_sum)                       # [G, 1, C]

        colblk_max = red_nt(jnp.where(mask, col_lse, NEG), jnp.max)
        m = jnp.maximum(row_max, colblk_max)                     # [1, N, 1]
        e_row = jnp.exp(row_max - m) * row_sum                   # [1, N, 1]
        e_col = red_nt(jnp.where(mask, jnp.exp(col_lse - m), 0.0),
                       jnp.sum)                                  # exp #2
        den_lse = m + jnp.log(e_row + e_col)                     # [1, N, 1]

        loss_ref[...] = (den_lse - nom_lse)[0]                   # [N, 1]

        # ---- rank metrics: compare-count instead of torch.sort ----
        # rank of positive value v in row i = #{k : s[i,k] > v}
        # (0-based descending position; ties get the best rank).
        inv_T = jnp.float32(1.0 / T)
        zero = jnp.zeros((1, N, 1), jnp.float32)
        rk = r1 = r5 = r10 = zero
        # T is small & static; the unrolled loop keeps every op tile-shaped.
        # TODO(synk): switch to lax.fori_loop / a tiled scheme for very large T.
        for t_idx in range(T):
            sel = cidx == (lo + t_idx)                           # one-hot/row
            v_t = red_nt(jnp.where(sel, s, 0.0), jnp.sum)        # [1, N, 1]
            rank_t = red_nt(jnp.where(s > v_t, 1.0, 0.0), jnp.sum)
            rk = rk + rank_t
            r1 = r1 + jnp.where(rank_t < 1.0, 1.0, 0.0)
            r5 = r5 + jnp.where(rank_t < 5.0, 1.0, 0.0)
            r10 = r10 + jnp.where(rank_t < 10.0, 1.0, 0.0)
        rk_ref[...] = (rk * inv_T)[0]
        r1_ref[...] = (r1 * inv_T)[0]
        r5_ref[...] = (r5 * inv_T)[0]
        r10_ref[...] = (r10 * inv_T)[0]


def _pick_tile_nt(nt):
    """Largest of (512, 256, 128) dividing NT, else NT itself (single tile)."""
    for cand in (512, 256, 128):
        if nt % cand == 0:
            return cand
    return nt


def mil_nce_head(v_feat, t_feat, temperature=0.1):
    """Pallas implementation of MILNCEHead.forward -> (losses, metric)."""
    N, D = v_feat.shape
    NT, D2 = t_feat.shape
    assert D == D2 and NT % N == 0
    T = NT // N
    tile_nt = _pick_tile_nt(NT)
    n_tiles = NT // tile_nt

    # bf16 inputs (native MXU path, half the DMA bytes); pre-transposed RHS.
    v_bf = v_feat.astype(jnp.bfloat16)
    tT_bf = t_feat.astype(jnp.bfloat16).T                 # [D, NT], lane-dense
    col_ids = jnp.arange(NT, dtype=jnp.int32).reshape(n_tiles, 1, tile_nt)

    kernel = functools.partial(_mil_nce_kernel, temperature=temperature, T=T)

    # Explicit VMEM budget: double-buffered bf16 inputs + f32 s scratch +
    # epilogue temporaries; floored/capped so it is valid on v5e/v6e/v7x.
    est = (2 * 2 * (N * D + D * tile_nt)     # 2 bufs x bf16 inputs
           + 12 * N * NT * 4                 # s scratch + f32 temporaries
           + (1 << 20))                      # headroom
    vmem_limit = int(min(max(est, 16 << 20), 32 << 20))

    row_shape = jax.ShapeDtypeStruct((N, 1), jnp.float32)
    row_spec = pl.BlockSpec((N, 1), lambda j: (0, 0))

    loss_rows, r1, r5, r10, rk = pl.pallas_call(
        kernel,
        out_shape=(row_shape,) * 5,
        grid_spec=pltpu.PrefetchScalarGridSpec(
            num_scalar_prefetch=0,
            grid=(n_tiles,),
            in_specs=[
                pl.BlockSpec((N, D), lambda j: (0, 0)),            # v: resident
                pl.BlockSpec((D, tile_nt), lambda j: (0, j)),      # t: streamed
                pl.BlockSpec((n_tiles, 1, tile_nt),
                             lambda j: (0, 0, 0)),                 # col ids
            ],
            out_specs=[row_spec] * 5,
            scratch_shapes=[pltpu.VMEM((n_tiles, N, tile_nt), jnp.float32)],
        ),
        compiler_params=pltpu.CompilerParams(
            # TODO(synk): on v7x, split N across the two TensorCores with a
            # 'parallel' leading axis plus a cross-core column-LSE reduction.
            dimension_semantics=("arbitrary",),
            vmem_limit_bytes=vmem_limit),
    )(v_bf, tT_bf, col_ids)

    losses = {"mil_nce_loss": jnp.mean(loss_rows)}
    metric = {
        "recall1": jnp.mean(r1),
        "recall5": jnp.mean(r5),
        "recall10": jnp.mean(r10),
        "mean_rk": jnp.mean(rk),
    }
    return losses, metric


def _reference_loss(v_feat, t_feat, temperature=0.1):
    """Pure-JAX mirror of the PyTorch MILNCEHead loss."""
    N = v_feat.shape[0]
    s = (v_feat @ t_feat.T) / temperature
    s = s.reshape(N, N, -1)
    nominator = (s * jnp.eye(N)[:, :, None]).sum(axis=1)
    nominator = jax.nn.logsumexp(nominator, axis=1)
    denominator = jnp.concatenate(
        (s, jnp.transpose(s, (1, 0, 2))), axis=1).reshape(N, -1)
    denominator = jax.nn.logsumexp(denominator, axis=1)
    return jnp.mean(denominator - nominator)


if __name__ == "__main__":
    # Small, TPU-aligned shapes: N=8 videos, T=16 texts/video, D=256 features.
    N, T, D = 8, 16, 256
    key = jax.random.PRNGKey(0)
    kv, kt = jax.random.split(key)
    v_feat = jax.random.normal(kv, (N, D), dtype=jnp.float32) * 0.1
    t_feat = jax.random.normal(kt, (N * T, D), dtype=jnp.float32) * 0.1

    losses, metric = mil_nce_head(v_feat, t_feat, temperature=0.1)
    jax.block_until_ready(losses["mil_nce_loss"])
    for val in metric.values():
        jax.block_until_ready(val)

    # Check the loss against a pure-JAX reference of the PyTorch math,
    # evaluated on the same bf16-rounded inputs the kernel feeds the MXU.
    v32 = v_feat.astype(jnp.bfloat16).astype(jnp.float32)
    t32 = t_feat.astype(jnp.bfloat16).astype(jnp.float32)
    ref = _reference_loss(v32, t32, temperature=0.1)
    assert jnp.allclose(losses["mil_nce_loss"], ref, rtol=1e-3, atol=1e-3), (
        float(losses["mil_nce_loss"]), float(ref))

    # Sanity bounds on the in-kernel rank metrics (tie-breaking vs torch.sort
    # can only differ when scores tie exactly).
    for name in ("recall1", "recall5", "recall10"):
        val = float(metric[name])
        assert 0.0 <= val <= 1.0, (name, val)
    assert 0.0 <= float(metric["mean_rk"]) <= float(N * T), metric["mean_rk"]

    print("KERNEL_OK")
</pallas_src>

<mosaic_0001>
module attributes {stable_mosaic.version = 11 : i64} {
  func.func @_mil_nce_kernel(%arg0: i32, %arg1: memref<8x256xbf16, #tpu.memory_space<vmem>>, %arg2: memref<256x128xbf16, #tpu.memory_space<vmem>>, %arg3: memref<1x1x128xi32, #tpu.memory_space<vmem>>, %arg4: memref<8x1xf32, #tpu.memory_space<vmem>>, %arg5: memref<8x1xf32, #tpu.memory_space<vmem>>, %arg6: memref<8x1xf32, #tpu.memory_space<vmem>>, %arg7: memref<8x1xf32, #tpu.memory_space<vmem>>, %arg8: memref<8x1xf32, #tpu.memory_space<vmem>>, %arg9: memref<1x8x128xf32, #tpu.memory_space<vmem>>) attributes {dimension_semantics = [#tpu.dimension_semantics<arbitrary>], iteration_bounds = array<i64: 1>, scalar_prefetch = 0 : i64, scratch_operands = 1 : i64, tpu.core_type = #tpu.core_type<tc>, window_params = [{pipeline_mode = #tpu.pipeline_mode<synchronous>, transform_indices = @transform_0, window_bounds = array<i64: 8, 256>}, {transform_indices = @transform_1, window_bounds = array<i64: 256, 128>}, {pipeline_mode = #tpu.pipeline_mode<synchronous>, transform_indices = @transform_2, window_bounds = array<i64: 1, 1, 128>}, {pipeline_mode = #tpu.pipeline_mode<synchronous>, transform_indices = @transform_3, window_bounds = array<i64: 8, 1>}, {pipeline_mode = #tpu.pipeline_mode<synchronous>, transform_indices = @transform_4, window_bounds = array<i64: 8, 1>}, {pipeline_mode = #tpu.pipeline_mode<synchronous>, transform_indices = @transform_5, window_bounds = array<i64: 8, 1>}, {pipeline_mode = #tpu.pipeline_mode<synchronous>, transform_indices = @transform_6, window_bounds = array<i64: 8, 1>}, {pipeline_mode = #tpu.pipeline_mode<synchronous>, transform_indices = @transform_7, window_bounds = array<i64: 8, 1>}]} {
    %c0 = arith.constant 0 : index
    %c0_0 = arith.constant 0 : index
    %0 = vector.load %arg1[%c0, %c0_0] : memref<8x256xbf16, #tpu.memory_space<vmem>>, vector<8x256xbf16>
    %c0_1 = arith.constant 0 : index
    %c0_2 = arith.constant 0 : index
    %1 = vector.load %arg2[%c0_1, %c0_2] : memref<256x128xbf16, #tpu.memory_space<vmem>>, vector<256x128xbf16>
    %cst = arith.constant dense<0.000000e+00> : vector<8x128xf32>
    %2 = tpu.matmul %0, %1, %cst {dimension_numbers = #tpu.dot_dimension_numbers<[1], [0], [0], [1], [0, 0, 1, 1], [], []>} : vector<8x256xbf16>, vector<256x128xbf16>, vector<8x128xf32> -> vector<8x128xf32>
    %cst_3 = arith.constant 1.000000e+01 : f32
    %3 = vector.broadcast %cst_3 : f32 to vector<8x128xf32>
    %4 = arith.mulf %2, %3 : vector<8x128xf32>
    %5 = arith.index_cast %arg0 : i32 to index
    %c0_4 = arith.constant 0 : index
    %c0_5 = arith.constant 0 : index
    %6 = vector.load %arg9[%5, %c0_4, %c0_5] : memref<1x8x128xf32, #tpu.memory_space<vmem>>, vector<1x8x128xf32>
    %7 = vector.shape_cast %6 : vector<1x8x128xf32> to vector<8x128xf32>
    %8 = vector.shape_cast %4 : vector<8x128xf32> to vector<1x8x128xf32>
    tpu.vector_store %arg9[%5, %c0_4, %c0_5], %8 {strides = array<i32>} : memref<1x8x128xf32, #tpu.memory_space<vmem>>, vector<1x8x128xf32>,
    %c0_i32 = arith.constant 0 : i32
    %9 = arith.cmpi eq, %arg0, %c0_i32 : i32
    %10 = arith.extui %9 : i1 to i32
    %c0_i32_6 = arith.constant 0 : i32
    %11 = arith.cmpi ne, %10, %c0_i32_6 : i32
    scf.if %11 {
      %c0_7 = arith.constant 0 : index
      %c0_8 = arith.constant 0 : index
      %c0_9 = arith.constant 0 : index
      %12 = vector.load %arg9[%c0_7, %c0_8, %c0_9] : memref<1x8x128xf32, #tpu.memory_space<vmem>>, vector<1x8x128xf32>
      %13 = tpu.iota {dimensions = array<i32: 1>} : vector<1x8x128xi32>
      %c0_10 = arith.constant 0 : index
      %c0_11 = arith.constant 0 : index
      %c0_12 = arith.constant 0 : index
      %14 = vector.load %arg3[%c0_10, %c0_11, %c0_12] : memref<1x1x128xi32, #tpu.memory_space<vmem>>, vector<1x1x128xi32>
      %c16_i32 = arith.constant 16 : i32
      %15 = vector.broadcast %c16_i32 : i32 to vector<1x8x128xi32>
      %16 = arith.muli %13, %15 : vector<1x8x128xi32>
      %17 = vector.broadcast %14 : vector<1x1x128xi32> to vector<1x8x128xi32>
      %18 = arith.cmpi sge, %17, %16 : vector<1x8x128xi32>
      %c16_i32_13 = arith.constant 16 : i32
      %19 = vector.broadcast %c16_i32_13 : i32 to vector<1x8x128xi32>
      %20 = arith.addi %16, %19 : vector<1x8x128xi32>
      %21 = vector.broadcast %14 : vector<1x1x128xi32> to vector<1x8x128xi32>
      %22 = arith.cmpi slt, %21, %20 : vector<1x8x128xi32>
      %23 = arith.andi %18, %22 : vector<1x8x128xi1>
      %cst_14 = arith.constant dense<0xFF800000> : vector<1x8xf32>
      %24 = vector.multi_reduction <maximumf>, %12, %cst_14 [2] : vector<1x8x128xf32> to vector<1x8xf32>
      %25 = vector.shape_cast %24 : vector<1x8xf32> to vector<1x8x1xf32>
      %cst_15 = arith.constant dense<0xFF800000> : vector<8x1xf32>
      %26 = vector.multi_reduction <maximumf>, %25, %cst_15 [0] : vector<1x8x1xf32> to vector<8x1xf32>
      %27 = vector.shape_cast %26 : vector<8x1xf32> to vector<1x8x1xf32>
      %28 = vector.broadcast %27 : vector<1x8x1xf32> to vector<1x8x128xf32>
      %29 = arith.subf %12, %28 : vector<1x8x128xf32>
      %30 = math.exp %29 : vector<1x8x128xf32>
      %cst_16 = arith.constant dense<0.000000e+00> : vector<1x8xf32>
      %31 = vector.multi_reduction <add>, %30, %cst_16 [2] : vector<1x8x128xf32> to vector<1x8xf32>
      %32 = vector.shape_cast %31 : vector<1x8xf32> to vector<1x8x1xf32>
      %cst_17 = arith.constant dense<0.000000e+00> : vector<8x1xf32>
      %33 = vector.multi_reduction <add>, %32, %cst_17 [0] : vector<1x8x1xf32> to vector<8x1xf32>
      %34 = vector.shape_cast %33 : vector<8x1xf32> to vector<1x8x1xf32>
      %cst_18 = arith.constant 0.000000e+00 : f32
      %35 = vector.broadcast %cst_18 : f32 to vector<1x8x128xf32>
      %36 = arith.select %23, %30, %35 : vector<1x8x128xi1>, vector<1x8x128xf32>
      %cst_19 = arith.constant dense<0.000000e+00> : vector<1x8xf32>
      %37 = vector.multi_reduction <add>, %36, %cst_19 [2] : vector<1x8x128xf32> to vector<1x8xf32>
      %38 = vector.shape_cast %37 : vector<1x8xf32> to vector<1x8x1xf32>
      %cst_20 = arith.constant dense<0.000000e+00> : vector<8x1xf32>
      %39 = vector.multi_reduction <add>, %38, %cst_20 [0] : vector<1x8x1xf32> to vector<8x1xf32>
      %40 = vector.shape_cast %39 : vector<8x1xf32> to vector<1x8x1xf32>
      %41 = math.log %40 : vector<1x8x1xf32>
      %42 = arith.addf %27, %41 : vector<1x8x1xf32>
      %cst_21 = arith.constant dense<0xFF800000> : vector<1x1xf32>
      %43 = vector.multi_reduction <maximumf>, %27, %cst_21 [1] : vector<1x8x1xf32> to vector<1x1xf32>
      %44 = vector.shape_cast %43 : vector<1x1xf32> to vector<1x1x1xf32>
      %45 = vector.broadcast %44 : vector<1x1x1xf32> to vector<1x8x1xf32>
      %46 = arith.subf %27, %45 : vector<1x8x1xf32>
      %47 = math.exp %46 : vector<1x8x1xf32>
      %48 = vector.broadcast %47 : vector<1x8x1xf32> to vector<1x8x128xf32>
      %49 = arith.mulf %30, %48 : vector<1x8x128xf32>
      %cst_22 = arith.constant dense<0.000000e+00> : vector<1x128xf32>
      %50 = vector.multi_reduction <add>, %49, %cst_22 [1] : vector<1x8x128xf32> to vector<1x128xf32>
      %51 = vector.shape_cast %50 : vector<1x128xf32> to vector<1x1x128xf32>
      %52 = math.log %51 : vector<1x1x128xf32>
      %53 = vector.broadcast %44 : vector<1x1x1xf32> to vector<1x1x128xf32>
      %54 = arith.addf %53, %52 : vector<1x1x128xf32>
      %cst_23 = arith.constant -1.000000e+30 : f32
      %55 = vector.shape_cast %54 : vector<1x1x128xf32> to vector<1x1x128xf32>
      %56 = vector.broadcast %55 : vector<1x1x128xf32> to vector<1x8x128xf32>
      %57 = vector.broadcast %cst_23 : f32 to vector<1x8x128xf32>
      %58 = arith.select %23, %56, %57 : vector<1x8x128xi1>, vector<1x8x128xf32>
      %cst_24 = arith.constant dense<0xFF800000> : vector<1x8xf32>
      %59 = vector.multi_reduction <maximumf>, %58, %cst_24 [2] : vector<1x8x128xf32> to vector<1x8xf32>
      %60 = vector.shape_cast %59 : vector<1x8xf32> to vector<1x8x1xf32>
      %cst_25 = arith.constant dense<0xFF800000> : vector<8x1xf32>
      %61 = vector.multi_reduction <maximumf>, %60, %cst_25 [0] : vector<1x8x1xf32> to vector<8x1xf32>
      %62 = vector.shape_cast %61 : vector<8x1xf32> to vector<1x8x1xf32>
      %63 = arith.maximumf %27, %62 : vector<1x8x1xf32>
      %64 = arith.subf %27, %63 : vector<1x8x1xf32>
      %65 = math.exp %64 : vector<1x8x1xf32>
      %66 = arith.mulf %65, %34 : vector<1x8x1xf32>
      %67 = vector.broadcast %54 : vector<1x1x128xf32> to vector<1x8x128xf32>
      %68 = vector.broadcast %63 : vector<1x8x1xf32> to vector<1x8x128xf32>
      %69 = arith.subf %67, %68 : vector<1x8x128xf32>
      %70 = math.exp %69 : vector<1x8x128xf32>
      %cst_26 = arith.constant 0.000000e+00 : f32
      %71 = vector.broadcast %cst_26 : f32 to vector<1x8x128xf32>
      %72 = arith.select %23, %70, %71 : vector<1x8x128xi1>, vector<1x8x128xf32>
      %cst_27 = arith.constant dense<0.000000e+00> : vector<1x8xf32>
      %73 = vector.multi_reduction <add>, %72, %cst_27 [2] : vector<1x8x128xf32> to vector<1x8xf32>
      %74 = vector.shape_cast %73 : vector<1x8xf32> to vector<1x8x1xf32>
      %cst_28 = arith.constant dense<0.000000e+00> : vector<8x1xf32>
      %75 = vector.multi_reduction <add>, %74, %cst_28 [0] : vector<1x8x1xf32> to vector<8x1xf32>
      %76 = vector.shape_cast %75 : vector<8x1xf32> to vector<1x8x1xf32>
      %77 = arith.addf %66, %76 : vector<1x8x1xf32>
      %78 = math.log %77 : vector<1x8x1xf32>
      %79 = arith.addf %63, %78 : vector<1x8x1xf32>
      %80 = arith.subf %79, %42 : vector<1x8x1xf32>
      %81 = vector.shape_cast %80 : vector<1x8x1xf32> to vector<8x1xf32>
      %c0_29 = arith.constant 0 : index
      %c0_30 = arith.constant 0 : index
      %82 = vector.load %arg4[%c0_29, %c0_30] : memref<8x1xf32, #tpu.memory_space<vmem>>, vector<8x1xf32>
      tpu.vector_store %arg4[%c0_29, %c0_30], %81 {strides = array<i32>} : memref<8x1xf32, #tpu.memory_space<vmem>>, vector<8x1xf32>,
      %cst_31 = arith.constant 0.000000e+00 : f32
      %83 = vector.broadcast %cst_31 : f32 to vector<1x8x1xf32>
      %c0_i32_32 = arith.constant 0 : i32
      %84 = vector.broadcast %c0_i32_32 : i32 to vector<1x8x128xi32>
      %85 = arith.addi %16, %84 : vector<1x8x128xi32>
      %86 = vector.broadcast %14 : vector<1x1x128xi32> to vector<1x8x128xi32>
      %87 = arith.cmpi eq, %86, %85 : vector<1x8x128xi32>
      %cst_33 = arith.constant 0.000000e+00 : f32
      %88 = vector.broadcast %cst_33 : f32 to vector<1x8x128xf32>
      %89 = arith.select %87, %12, %88 : vector<1x8x128xi1>, vector<1x8x128xf32>
      %cst_34 = arith.constant dense<0.000000e+00> : vector<1x8xf32>
      %90 = vector.multi_reduction <add>, %89, %cst_34 [2] : vector<1x8x128xf32> to vector<1x8xf32>
      %91 = vector.shape_cast %90 : vector<1x8xf32> to vector<1x8x1xf32>
      %cst_35 = arith.constant dense<0.000000e+00> : vector<8x1xf32>
      %92 = vector.multi_reduction <add>, %91, %cst_35 [0] : vector<1x8x1xf32> to vector<8x1xf32>
      %93 = vector.shape_cast %92 : vector<8x1xf32> to vector<1x8x1xf32>
      %94 = vector.broadcast %93 : vector<1x8x1xf32> to vector<1x8x128xf32>
      %95 = arith.cmpf ogt, %12, %94 : vector<1x8x128xf32>
      %cst_36 = arith.constant 1.000000e+00 : f32
      %cst_37 = arith.constant 0.000000e+00 : f32
      %96 = vector.broadcast %cst_36 : f32 to vector<1x8x128xf32>
      %97 = vector.broadcast %cst_37 : f32 to vector<1x8x128xf32>
      %98 = arith.select %95, %96, %97 : vector<1x8x128xi1>, vector<1x8x128xf32>
      %cst_38 = arith.constant dense<0.000000e+00> : vector<1x8xf32>
      %99 = vector.multi_reduction <add>, %98, %cst_38 [2] : vector<1x8x128xf32> to vector<1x8xf32>
      %100 = vector.shape_cast %99 : vector<1x8xf32> to vector<1x8x1xf32>
      %cst_39 = arith.constant dense<0.000000e+00> : vector<8x1xf32>
      %101 = vector.multi_reduction <add>, %100, %cst_39 [0] : vector<1x8x1xf32> to vector<8x1xf32>
      %102 = vector.shape_cast %101 : vector<8x1xf32> to vector<1x8x1xf32>
      %103 = arith.addf %83, %102 : vector<1x8x1xf32>
      %cst_40 = arith.constant 1.000000e+00 : f32
      %104 = vector.broadcast %cst_40 : f32 to vector<1x8x1xf32>
      %105 = arith.cmpf olt, %102, %104 : vector<1x8x1xf32>
      %cst_41 = arith.constant 1.000000e+00 : f32
      %cst_42 = arith.constant 0.000000e+00 : f32
      %106 = vector.broadcast %cst_41 : f32 to vector<1x8x1xf32>
      %107 = vector.broadcast %cst_42 : f32 to vector<1x8x1xf32>
      %108 = arith.select %105, %106, %107 : vector<1x8x1xi1>, vector<1x8x1xf32>
      %109 = arith.addf %83, %108 : vector<1x8x1xf32>
      %cst_43 = arith.constant 5.000000e+00 : f32
      %110 = vector.broadcast %cst_43 : f32 to vector<1x8x1xf32>
      %111 = arith.cmpf olt, %102, %110 : vector<1x8x1xf32>
      %cst_44 = arith.constant 1.000000e+00 : f32
      %cst_45 = arith.constant 0.000000e+00 : f32
      %112 = vector.broadcast %cst_44 : f32 to vector<1x8x1xf32>
      %113 = vector.broadcast %cst_45 : f32 to vector<1x8x1xf32>
      %114 = arith.select %111, %112, %113 : vector<1x8x1xi1>, vector<1x8x1xf32>
      %115 = arith.addf %83, %114 : vector<1x8x1xf32>
      %cst_46 = arith.constant 1.000000e+01 : f32
      %116 = vector.broadcast %cst_46 : f32 to vector<1x8x1xf32>
      %117 = arith.cmpf olt, %102, %116 : vector<1x8x1xf32>
      %cst_47 = arith.constant 1.000000e+00 : f32
      %cst_48 = arith.constant 0.000000e+00 : f32
      %118 = vector.broadcast %cst_47 : f32 to vector<1x8x1xf32>
      %119 = vector.broadcast %cst_48 : f32 to vector<1x8x1xf32>
      %120 = arith.select %117, %118, %119 : vector<1x8x1xi1>, vector<1x8x1xf32>
      %121 = arith.addf %83, %120 : vector<1x8x1xf32>
      %c1_i32 = arith.constant 1 : i32
      %122 = vector.broadcast %c1_i32 : i32 to vector<1x8x128xi32>
      %123 = arith.addi %16, %122 : vector<1x8x128xi32>
      %124 = vector.broadcast %14 : vector<1x1x128xi32> to vector<1x8x128xi32>
      %125 = arith.cmpi eq, %124, %123 : vector<1x8x128xi32>
      %cst_49 = arith.constant 0.000000e+00 : f32
      %126 = vector.broadcast %cst_49 : f32 to vector<1x8x128xf32>
      %127 = arith.select %125, %12, %126 : vector<1x8x128xi1>, vector<1x8x128xf32>
      %cst_50 = arith.constant dense<0.000000e+00> : vector<1x8xf32>
      %128 = vector.multi_reduction <add>, %127, %cst_50 [2] : vector<1x8x128xf32> to vector<1x8xf32>
      %129 = vector.shape_cast %128 : vector<1x8xf32> to vector<1x8x1xf32>
      %cst_51 = arith.constant dense<0.000000e+00> : vector<8x1xf32>
      %130 = vector.multi_reduction <add>, %129, %cst_51 [0] : vector<1x8x1xf32> to vector<8x1xf32>
      %131 = vector.shape_cast %130 : vector<8x1xf32> to vector<1x8x1xf32>
      %132 = vector.broadcast %131 : vector<1x8x1xf32> to vector<1x8x128xf32>
      %133 = arith.cmpf ogt, %12, %132 : vector<1x8x128xf32>
      %cst_52 = arith.constant 1.000000e+00 : f32
      %cst_53 = arith.constant 0.000000e+00 : f32
      %134 = vector.broadcast %cst_52 : f32 to vector<1x8x128xf32>
      %135 = vector.broadcast %cst_53 : f32 to vector<1x8x128xf32>
      %136 = arith.select %133, %134, %135 : vector<1x8x128xi1>, vector<1x8x128xf32>
      %cst_54 = arith.constant dense<0.000000e+00> : vector<1x8xf32>
      %137 = vector.multi_reduction <add>, %136, %cst_54 [2] : vector<1x8x128xf32> to vector<1x8xf32>
      %138 = vector.shape_cast %137 : vector<1x8xf32> to vector<1x8x1xf32>
      %cst_55 = arith.constant dense<0.000000e+00> : vector<8x1xf32>
      %139 = vector.multi_reduction <add>, %138, %cst_55 [0] : vector<1x8x1xf32> to vector<8x1xf32>
      %140 = vector.shape_cast %139 : vector<8x1xf32> to vector<1x8x1xf32>
      %141 = arith.addf %103, %140 : vector<1x8x1xf32>
      %cst_56 = arith.constant 1.000000e+00 : f32
      %142 = vector.broadcast %cst_56 : f32 to vector<1x8x1xf32>
      %143 = arith.cmpf olt, %140, %142 : vector<1x8x1xf32>
      %cst_57 = arith.constant 1.000000e+00 : f32
      %cst_58 = arith.constant 0.000000e+00 : f32
      %144 = vector.broadcast %cst_57 : f32 to vector<1x8x1xf32>
      %145 = vector.broadcast %cst_58 : f32 to vector<1x8x1xf32>
      %146 = arith.select %143, %144, %145 : vector<1x8x1xi1>, vector<1x8x1xf32>
      %147 = arith.addf %109, %146 : vector<1x8x1xf32>
      %cst_59 = arith.constant 5.000000e+00 : f32
      %148 = vector.broadcast %cst_59 : f32 to vector<1x8x1xf32>
      %149 = arith.cmpf olt, %140, %148 : vector<1x8x1xf32>
      %cst_60 = arith.constant 1.000000e+00 : f32
      %cst_61 = arith.constant 0.000000e+00 : f32
      %150 = vector.broadcast %cst_60 : f32 to vector<1x8x1xf32>
      %151 = vector.broadcast %cst_61 : f32 to vector<1x8x1xf32>
      %152 = arith.select %149, %150, %151 : vector<1x8x1xi1>, vector<1x8x1xf32>
      %153 = arith.addf %115, %152 : vector<1x8x1xf32>
      %cst_62 = arith.constant 1.000000e+01 : f32
      %154 = vector.broadcast %cst_62 : f32 to vector<1x8x1xf32>
      %155 = arith.cmpf olt, %140, %154 : vector<1x8x1xf32>
      %cst_63 = arith.constant 1.000000e+00 : f32
      %cst_64 = arith.constant 0.000000e+00 : f32
      %156 = vector.broadcast %cst_63 : f32 to vector<1x8x1xf32>
      %157 = vector.broadcast %cst_64 : f32 to vector<1x8x1xf32>
      %158 = arith.select %155, %156, %157 : vector<1x8x1xi1>, vector<1x8x1xf32>
      %159 = arith.addf %121, %158 : vector<1x8x1xf32>
      %c2_i32 = arith.constant 2 : i32
      %160 = vector.broadcast %c2_i32 : i32 to vector<1x8x128xi32>
      %161 = arith.addi %16, %160 : vector<1x8x128xi32>
      %162 = vector.broadcast %14 : vector<1x1x128xi32> to vector<1x8x128xi32>
      %163 = arith.cmpi eq, %162, %161 : vector<1x8x128xi32>
      %cst_65 = arith.constant 0.000000e+00 : f32
      %164 = vector.broadcast %cst_65 : f32 to vector<1x8x128xf32>
      %165 = arith.select %163, %12, %164 : vector<1x8x128xi1>, vector<1x8x128xf32>
      %cst_66 = arith.constant dense<0.000000e+00> : vector<1x8xf32>
      %166 = vector.multi_reduction <add>, %165, %cst_66 [2] : vector<1x8x128xf32> to vector<1x8xf32>
      %167 = vector.shape_cast %166 : vector<1x8xf32> to vector<1x8x1xf32>
      %cst_67 = arith.constant dense<0.000000e+00> : vector<8x1xf32>
      %168 = vector.multi_reduction <add>, %167, %cst_67 [0] : vector<1x8x1xf32> to vector<8x1xf32>
      %169 = vector.shape_cast %168 : vector<8x1xf32> to vector<1x8x1xf32>
      %170 = vector.broadcast %169 : vector<1x8x1xf32> to vector<1x8x128xf32>
      %171 = arith.cmpf ogt, %12, %170 : vector<1x8x128xf32>
      %cst_68 = arith.constant 1.000000e+00 : f32
      %cst_69 = arith.constant 0.000000e+00 : f32
      %172 = vector.broadcast %cst_68 : f32 to vector<1x8x128xf32>
      %173 = vector.broadcast %cst_69 : f32 to vector<1x8x128xf32>
      %174 = arith.select %171, %172, %173 : vector<1x8x128xi1>, vector<1x8x128xf32>
      %cst_70 = arith.constant dense<0.000000e+00> : vector<1x8xf32>
      %175 = vector.multi_reduction <add>, %174, %cst_70 [2] : vector<1x8x128xf32> to vector<1x8xf32>
      %176 = vector.shape_cast %175 : vector<1x8xf32> to vector<1x8x1xf32>
      %cst_71 = arith.constant dense<0.000000e+00> : vector<8x1xf32>
      %177 = vector.multi_reduction <add>, %176, %cst_71 [0] : vector<1x8x1xf32> to vector<8x1xf32>
      %178 = vector.shape_cast %177 : vector<8x1xf32> to vector<1x8x1xf32>
      %179 = arith.addf %141, %178 : vector<1x8x1xf32>
      %cst_72 = arith.constant 1.000000e+00 : f32
      %180 = vector.broadcast %cst_72 : f32 to vector<1x8x1xf32>
      %181 = arith.cmpf olt, %178, %180 : vector<1x8x1xf32>
      %cst_73 = arith.constant 1.000000e+00 : f32
      %cst_74 = arith.constant 0.000000e+00 : f32
      %182 = vector.broadcast %cst_73 : f32 to vector<1x8x1xf32>
      %183 = vector.broadcast %cst_74 : f32 to vector<1x8x1xf32>
      %184 = arith.select %181, %182, %183 : vector<1x8x1xi1>, vector<1x8x1xf32>
      %185 = arith.addf %147, %184 : vector<1x8x1xf32>
      %cst_75 = arith.constant 5.000000e+00 : f32
      %186 = vector.broadcast %cst_75 : f32 to vector<1x8x1xf32>
      %187 = arith.cmpf olt, %178, %186 : vector<1x8x1xf32>
      %cst_76 = arith.constant 1.000000e+00 : f32
      %cst_77 = arith.constant 0.000000e+00 : f32
      %188 = vector.broadcast %cst_76 : f32 to vector<1x8x1xf32>
      %189 = vector.broadcast %cst_77 : f32 to vector<1x8x1xf32>
      %190 = arith.select %187, %188, %189 : vector<1x8x1xi1>, vector<1x8x1xf32>
      %191 = arith.addf %153, %190 : vector<1x8x1xf32>
      %cst_78 = arith.constant 1.000000e+01 : f32
      %192 = vector.broadcast %cst_78 : f32 to vector<1x8x1xf32>
      %193 = arith.cmpf olt, %178, %192 : vector<1x8x1xf32>
      %cst_79 = arith.constant 1.000000e+00 : f32
      %cst_80 = arith.constant 0.000000e+00 : f32
      %194 = vector.broadcast %cst_79 : f32 to vector<1x8x1xf32>
      %195 = vector.broadcast %cst_80 : f32 to vector<1x8x1xf32>
      %196 = arith.select %193, %194, %195 : vector<1x8x1xi1>, vector<1x8x1xf32>
      %197 = arith.addf %159, %196 : vector<1x8x1xf32>
      %c3_i32 = arith.constant 3 : i32
      %198 = vector.broadcast %c3_i32 : i32 to vector<1x8x128xi32>
      %199 = arith.addi %16, %198 : vector<1x8x128xi32>
      %200 = vector.broadcast %14 : vector<1x1x128xi32> to vector<1x8x128xi32>
      %201 = arith.cmpi eq, %200, %199 : vector<1x8x128xi32>
      %cst_81 = arith.constant 0.000000e+00 : f32
      %202 = vector.broadcast %cst_81 : f32 to vector<1x8x128xf32>
      %203 = arith.select %201, %12, %202 : vector<1x8x128xi1>, vector<1x8x128xf32>
      %cst_82 = arith.constant dense<0.000000e+00> : vector<1x8xf32>
      %204 = vector.multi_reduction <add>, %203, %cst_82 [2] : vector<1x8x128xf32> to vector<1x8xf32>
      %205 = vector.shape_cast %204 : vector<1x8xf32> to vector<1x8x1xf32>
      %cst_83 = arith.constant dense<0.000000e+00> : vector<8x1xf32>
      %206 = vector.multi_reduction <add>, %205, %cst_83 [0] : vector<1x8x1xf32> to vector<8x1xf32>
      %207 = vector.shape_cast %206 : vector<8x1xf32> to vector<1x8x1xf32>
      %208 = vector.broadcast %207 : vector<1x8x1xf32> to vector<1x8x128xf32>
      %209 = arith.cmpf ogt, %12, %208 : vector<1x8x128xf32>
      %cst_84 = arith.constant 1.000000e+00 : f32
      %cst_85 = arith.constant 0.000000e+00 : f32
      %210 = vector.broadcast %cst_84 : f32 to vector<1x8x128xf32>
      %211 = vector.broadcast %cst_85 : f32 to vector<1x8x128xf32>
      %212 = arith.select %209, %210, %211 : vector<1x8x128xi1>, vector<1x8x128xf32>
      %cst_86 = arith.constant dense<0.000000e+00> : vector<1x8xf32>
      %213 = vector.multi_reduction <add>, %212, %cst_86 [2] : vector<1x8x128xf32> to vector<1x8xf32>
      %214 = vector.shape_cast %213 : vector<1x8xf32> to vector<1x8x1xf32>
      %cst_87 = arith.constant dense<0.000000e+00> : vector<8x1xf32>
      %215 = vector.multi_reduction <add>, %214, %cst_87 [0] : vector<1x8x1xf32> to vector<8x1xf32>
      %216 = vector.shape_cast %215 : vector<8x1xf32> to vector<1x8x1xf32>
      %217 = arith.addf %179, %216 : vector<1x8x1xf32>
      %cst_88 = arith.constant 1.000000e+00 : f32
      %218 = vector.broadcast %cst_88 : f32 to vector<1x8x1xf32>
      %219 = arith.cmpf olt, %216, %218 : vector<1x8x1xf32>
      %cst_89 = arith.constant 1.000000e+00 : f32
      %cst_90 = arith.constant 0.000000e+00 : f32
      %220 = vector.broadcast %cst_89 : f32 to vector<1x8x1xf32>
      %221 = vector.broadcast %cst_90 : f32 to vector<1x8x1xf32>
      %222 = arith.select %219, %220, %221 : vector<1x8x1xi1>, vector<1x8x1xf32>
      %223 = arith.addf %185, %222 : vector<1x8x1xf32>
      %cst_91 = arith.constant 5.000000e+00 : f32
      %224 = vector.broadcast %cst_91 : f32 to vector<1x8x1xf32>
      %225 = arith.cmpf olt, %216, %224 : vector<1x8x1xf32>
      %cst_92 = arith.constant 1.000000e+00 : f32
      %cst_93 = arith.constant 0.000000e+00 : f32
      %226 = vector.broadcast %cst_92 : f32 to vector<1x8x1xf32>
      %227 = vector.broadcast %cst_93 : f32 to vector<1x8x1xf32>
      %228 = arith.select %225, %226, %227 : vector<1x8x1xi1>, vector<1x8x1xf32>
      %229 = arith.addf %191, %228 : vector<1x8x1xf32>
      %cst_94 = arith.constant 1.000000e+01 : f32
      %230 = vector.broadcast %cst_94 : f32 to vector<1x8x1xf32>
      %231 = arith.cmpf olt, %216, %230 : vector<1x8x1xf32>
      %cst_95 = arith.constant 1.000000e+00 : f32
      %cst_96 = arith.constant 0.000000e+00 : f32
      %232 = vector.broadcast %cst_95 : f32 to vector<1x8x1xf32>
      %233 = vector.broadcast %cst_96 : f32 to vector<1x8x1xf32>
      %234 = arith.select %231, %232, %233 : vector<1x8x1xi1>, vector<1x8x1xf32>
      %235 = arith.addf %197, %234 : vector<1x8x1xf32>
      %c4_i32 = arith.constant 4 : i32
      %236 = vector.broadcast %c4_i32 : i32 to vector<1x8x128xi32>
      %237 = arith.addi %16, %236 : vector<1x8x128xi32>
      %238 = vector.broadcast %14 : vector<1x1x128xi32> to vector<1x8x128xi32>
      %239 = arith.cmpi eq, %238, %237 : vector<1x8x128xi32>
      %cst_97 = arith.constant 0.000000e+00 : f32
      %240 = vector.broadcast %cst_97 : f32 to vector<1x8x128xf32>
      %241 = arith.select %239, %12, %240 : vector<1x8x128xi1>, vector<1x8x128xf32>
      %cst_98 = arith.constant dense<0.000000e+00> : vector<1x8xf32>
      %242 = vector.multi_reduction <add>, %241, %cst_98 [2] : vector<1x8x128xf32> to vector<1x8xf32>
      %243 = vector.shape_cast %242 : vector<1x8xf32> to vector<1x8x1xf32>
      %cst_99 = arith.constant dense<0.000000e+00> : vector<8x1xf32>
      %244 = vector.multi_reduction <add>, %243, %cst_99 [0] : vector<1x8x1xf32> to vector<8x1xf32>
      %245 = vector.shape_cast %244 : vector<8x1xf32> to vector<1x8x1xf32>
      %246 = vector.broadcast %245 : vector<1x8x1xf32> to vector<1x8x128xf32>
      %247 = arith.cmpf ogt, %12, %246 : vector<1x8x128xf32>
      %cst_100 = arith.constant 1.000000e+00 : f32
      %cst_101 = arith.constant 0.000000e+00 : f32
      %248 = vector.broadcast %cst_100 : f32 to vector<1x8x128xf32>
      %249 = vector.broadcast %cst_101 : f32 to vector<1x8x128xf32>
      %250 = arith.select %247, %248, %249 : vector<1x8x128xi1>, vector<1x8x128xf32>
      %cst_102 = arith.constant dense<0.000000e+00> : vector<1x8xf32>
      %251 = vector.multi_reduction <add>, %250, %cst_102 [2] : vector<1x8x128xf32> to vector<1x8xf32>
      %252 = vector.shape_cast %251 : vector<1x8xf32> to vector<1x8x1xf32>
      %cst_103 = arith.constant dense<0.000000e+00> : vector<8x1xf32>
      %253 = vector.multi_reduction <add>, %252, %cst_103 [0] : vector<1x8x1xf32> to vector<8x1xf32>
      %254 = vector.shape_cast %253 : vector<8x1xf32> to vector<1x8x1xf32>
      %255 = arith.addf %217, %254 : vector<1x8x1xf32>
      %cst_104 = arith.constant 1.000000e+00 : f32
      %256 = vector.broadcast %cst_104 : f32 to vector<1x8x1xf32>
      %257 = arith.cmpf olt, %254, %256 : vector<1x8x1xf32>
      %cst_105 = arith.constant 1.000000e+00 : f32
      %cst_106 = arith.constant 0.000000e+00 : f32
      %258 = vector.broadcast %cst_105 : f32 to vector<1x8x1xf32>
      %259 = vector.broadcast %cst_106 : f32 to vector<1x8x1xf32>
      %260 = arith.select %257, %258, %259 : vector<1x8x1xi1>, vector<1x8x1xf32>
      %261 = arith.addf %223, %260 : vector<1x8x1xf32>
      %cst_107 = arith.constant 5.000000e+00 : f32
      %262 = vector.broadcast %cst_107 : f32 to vector<1x8x1xf32>
      %263 = arith.cmpf olt, %254, %262 : vector<1x8x1xf32>
      %cst_108 = arith.constant 1.000000e+00 : f32
      %cst_109 = arith.constant 0.000000e+00 : f32
      %264 = vector.broadcast %cst_108 : f32 to vector<1x8x1xf32>
      %265 = vector.broadcast %cst_109 : f32 to vector<1x8x1xf32>
      %266 = arith.select %263, %264, %265 : vector<1x8x1xi1>, vector<1x8x1xf32>
      %267 = arith.addf %229, %266 : vector<1x8x1xf32>
      %cst_110 = arith.constant 1.000000e+01 : f32
      %268 = vector.broadcast %cst_110 : f32 to vector<1x8x1xf32>
      %269 = arith.cmpf olt, %254, %268 : vector<1x8x1xf32>
      %cst_111 = arith.constant 1.000000e+00 : f32
      %cst_112 = arith.constant 0.000000e+00 : f32
      %270 = vector.broadcast %cst_111 : f32 to vector<1x8x1xf32>
      %271 = vector.broadcast %cst_112 : f32 to vector<1x8x1xf32>
      %272 = arith.select %269, %270, %271 : vector<1x8x1xi1>, vector<1x8x1xf32>
      %273 = arith.addf %235, %272 : vector<1x8x1xf32>
      %c5_i32 = arith.constant 5 : i32
      %274 = vector.broadcast %c5_i32 : i32 to vector<1x8x128xi32>
      %275 = arith.addi %16, %274 : vector<1x8x128xi32>
      %276 = vector.broadcast %14 : vector<1x1x128xi32> to vector<1x8x128xi32>
      %277 = arith.cmpi eq, %276, %275 : vector<1x8x128xi32>
      %cst_113 = arith.constant 0.000000e+00 : f32
      %278 = vector.broadcast %cst_113 : f32 to vector<1x8x128xf32>
      %279 = arith.select %277, %12, %278 : vector<1x8x128xi1>, vector<1x8x128xf32>
      %cst_114 = arith.constant dense<0.000000e+00> : vector<1x8xf32>
      %280 = vector.multi_reduction <add>, %279, %cst_114 [2] : vector<1x8x128xf32> to vector<1x8xf32>
      %281 = vector.shape_cast %280 : vector<1x8xf32> to vector<1x8x1xf32>
      %cst_115 = arith.constant dense<0.000000e+00> : vector<8x1xf32>
      %282 = vector.multi_reduction <add>, %281, %cst_115 [0] : vector<1x8x1xf32> to vector<8x1xf32>
      %283 = vector.shape_cast %282 : vector<8x1xf32> to vector<1x8x1xf32>
      %284 = vector.broadcast %283 : vector<1x8x1xf32> to vector<1x8x128xf32>
      %285 = arith.cmpf ogt, %12, %284 : vector<1x8x128xf32>
      %cst_116 = arith.constant 1.000000e+00 : f32
      %cst_117 = arith.constant 0.000000e+00 : f32
      %286 = vector.broadcast %cst_116 : f32 to vector<1x8x128xf32>
      %287 = vector.broadcast %cst_117 : f32 to vector<1x8x128xf32>
      %288 = arith.select %285, %286, %287 : vector<1x8x128xi1>, vector<1x8x128xf32>
      %cst_118 = arith.constant dense<0.000000e+00> : vector<1x8xf32>
      %289 = vector.multi_reduction <add>, %288, %cst_118 [2] : vector<1x8x128xf32> to vector<1x8xf32>
      %290 = vector.shape_cast %289 : vector<1x8xf32> to vector<1x8x1xf32>
      %cst_119 = arith.constant dense<0.000000e+00> : vector<8x1xf32>
      %291 = vector.multi_reduction <add>, %290, %cst_119 [0] : vector<1x8x1xf32> to vector<8x1xf32>
      %292 = vector.shape_cast %291 : vector<8x1xf32> to vector<1x8x1xf32>
      %293 = arith.addf %255, %292 : vector<1x8x1xf32>
      %cst_120 = arith.constant 1.000000e+00 : f32
      %294 = vector.broadcast %cst_120 : f32 to vector<1x8x1xf32>
      %295 = arith.cmpf olt, %292, %294 : vector<1x8x1xf32>
      %cst_121 = arith.constant 1.000000e+00 : f32
      %cst_122 = arith.constant 0.000000e+00 : f32
      %296 = vector.broadcast %cst_121 : f32 to vector<1x8x1xf32>
      %297 = vector.broadcast %cst_122 : f32 to vector<1x8x1xf32>
      %298 = arith.select %295, %296, %297 : vector<1x8x1xi1>, vector<1x8x1xf32>
      %299 = arith.addf %261, %298 : vector<1x8x1xf32>
      %cst_123 = arith.constant 5.000000e+00 : f32
      %300 = vector.broadcast %cst_123 : f32 to vector<1x8x1xf32>
      %301 = arith.cmpf olt, %292, %300 : vector<1x8x1xf32>
      %cst_124 = arith.constant 1.000000e+00 : f32
      %cst_125 = arith.constant 0.000000e+00 : f32
      %302 = vector.broadcast %cst_124 : f32 to vector<1x8x1xf32>
      %303 = vector.broadcast %cst_125 : f32 to vector<1x8x1xf32>
      %304 = arith.select %301, %302, %303 : vector<1x8x1xi1>, vector<1x8x1xf32>
      %305 = arith.addf %267, %304 : vector<1x8x1xf32>
      %cst_126 = arith.constant 1.000000e+01 : f32
      %306 = vector.broadcast %cst_126 : f32 to vector<1x8x1xf32>
      %307 = arith.cmpf olt, %292, %306 : vector<1x8x1xf32>
      %cst_127 = arith.constant 1.000000e+00 : f32
      %cst_128 = arith.constant 0.000000e+00 : f32
      %308 = vector.broadcast %cst_127 : f32 to vector<1x8x1xf32>
      %309 = vector.broadcast %cst_128 : f32 to vector<1x8x1xf32>
      %310 = arith.select %307, %308, %309 : vector<1x8x1xi1>, vector<1x8x1xf32>
      %311 = arith.addf %273, %310 : vector<1x8x1xf32>
      %c6_i32 = arith.constant 6 : i32
      %312 = vector.broadcast %c6_i32 : i32 to vector<1x8x128xi32>
      %313 = arith.addi %16, %312 : vector<1x8x128xi32>
      %314 = vector.broadcast %14 : vector<1x1x128xi32> to vector<1x8x128xi32>
      %315 = arith.cmpi eq, %314, %313 : vector<1x8x128xi32>
      %cst_129 = arith.constant 0.000000e+00 : f32
      %316 = vector.broadcast %cst_129 : f32 to vector<1x8x128xf32>
      %317 = arith.select %315, %12, %316 : vector<1x8x128xi1>, vector<1x8x128xf32>
      %cst_130 = arith.constant dense<0.000000e+00> : vector<1x8xf32>
      %318 = vector.multi_reduction <add>, %317, %cst_130 [2] : vector<1x8x128xf32> to vector<1x8xf32>
      %319 = vector.shape_cast %318 : vector<1x8xf32> to vector<1x8x1xf32>
      %cst_131 = arith.constant dense<0.000000e+00> : vector<8x1xf32>
      %320 = vector.multi_reduction <add>, %319, %cst_131 [0] : vector<1x8x1xf32> to vector<8x1xf32>
      %321 = vector.shape_cast %320 : vector<8x1xf32> to vector<1x8x1xf32>
      %322 = vector.broadcast %321 : vector<1x8x1xf32> to vector<1x8x128xf32>
      %323 = arith.cmpf ogt, %12, %322 : vector<1x8x128xf32>
      %cst_132 = arith.constant 1.000000e+00 : f32
      %cst_133 = arith.constant 0.000000e+00 : f32
      %324 = vector.broadcast %cst_132 : f32 to vector<1x8x128xf32>
      %325 = vector.broadcast %cst_133 : f32 to vector<1x8x128xf32>
      %326 = arith.select %323, %324, %325 : vector<1x8x128xi1>, vector<1x8x128xf32>
      %cst_134 = arith.constant dense<0.000000e+00> : vector<1x8xf32>
      %327 = vector.multi_reduction <add>, %326, %cst_134 [2] : vector<1x8x128xf32> to vector<1x8xf32>
      %328 = vector.shape_cast %327 : vector<1x8xf32> to vector<1x8x1xf32>
      %cst_135 = arith.constant dense<0.000000e+00> : vector<8x1xf32>
      %329 = vector.multi_reduction <add>, %328, %cst_135 [0] : vector<1x8x1xf32> to vector<8x1xf32>
      %330 = vector.shape_cast %329 : vector<8x1xf32> to vector<1x8x1xf32>
      %331 = arith.addf %293, %330 : vector<1x8x1xf32>
      %cst_136 = arith.constant 1.000000e+00 : f32
      %332 = vector.broadcast %cst_136 : f32 to vector<1x8x1xf32>
      %333 = arith.cmpf olt, %330, %332 : vector<1x8x1xf32>
      %cst_137 = arith.constant 1.000000e+00 : f32
      %cst_138 = arith.constant 0.000000e+00 : f32
      %334 = vector.broadcast %cst_137 : f32 to vector<1x8x1xf32>
      %335 = vector.broadcast %cst_138 : f32 to vector<1x8x1xf32>
      %336 = arith.select %333, %334, %335 : vector<1x8x1xi1>, vector<1x8x1xf32>
      %337 = arith.addf %299, %336 : vector<1x8x1xf32>
      %cst_139 = arith.constant 5.000000e+00 : f32
      %338 = vector.broadcast %cst_139 : f32 to vector<1x8x1xf32>
      %339 = arith.cmpf olt, %330, %338 : vector<1x8x1xf32>
      %cst_140 = arith.constant 1.000000e+00 : f32
      %cst_141 = arith.constant 0.000000e+00 : f32
      %340 = vector.broadcast %cst_140 : f32 to vector<1x8x1xf32>
      %341 = vector.broadcast %cst_141 : f32 to vector<1x8x1xf32>
      %342 = arith.select %339, %340, %341 : vector<1x8x1xi1>, vector<1x8x1xf32>
      %343 = arith.addf %305, %342 : vector<1x8x1xf32>
      %cst_142 = arith.constant 1.000000e+01 : f32
      %344 = vector.broadcast %cst_142 : f32 to vector<1x8x1xf32>
      %345 = arith.cmpf olt, %330, %344 : vector<1x8x1xf32>
      %cst_143 = arith.constant 1.000000e+00 : f32
      %cst_144 = arith.constant 0.000000e+00 : f32
      %346 = vector.broadcast %cst_143 : f32 to vector<1x8x1xf32>
      %347 = vector.broadcast %cst_144 : f32 to vector<1x8x1xf32>
      %348 = arith.select %345, %346, %347 : vector<1x8x1xi1>, vector<1x8x1xf32>
      %349 = arith.addf %311, %348 : vector<1x8x1xf32>
      %c7_i32 = arith.constant 7 : i32
      %350 = vector.broadcast %c7_i32 : i32 to vector<1x8x128xi32>
      %351 = arith.addi %16, %350 : vector<1x8x128xi32>
      %352 = vector.broadcast %14 : vector<1x1x128xi32> to vector<1x8x128xi32>
      %353 = arith.cmpi eq, %352, %351 : vector<1x8x128xi32>
      %cst_145 = arith.constant 0.000000e+00 : f32
      %354 = vector.broadcast %cst_145 : f32 to vector<1x8x128xf32>
      %355 = arith.select %353, %12, %354 : vector<1x8x128xi1>, vector<1x8x128xf32>
      %cst_146 = arith.constant dense<0.000000e+00> : vector<1x8xf32>
      %356 = vector.multi_reduction <add>, %355, %cst_146 [2] : vector<1x8x128xf32> to vector<1x8xf32>
      %357 = vector.shape_cast %356 : vector<1x8xf32> to vector<1x8x1xf32>
      %cst_147 = arith.constant dense<0.000000e+00> : vector<8x1xf32>
      %358 = vector.multi_reduction <add>, %357, %cst_147 [0] : vector<1x8x1xf32> to vector<8x1xf32>
      %359 = vector.shape_cast %358 : vector<8x1xf32> to vector<1x8x1xf32>
      %360 = vector.broadcast %359 : vector<1x8x1xf32> to vector<1x8x128xf32>
      %361 = arith.cmpf ogt, %12, %360 : vector<1x8x128xf32>
      %cst_148 = arith.constant 1.000000e+00 : f32
      %cst_149 = arith.constant 0.000000e+00 : f32
      %362 = vector.broadcast %cst_148 : f32 to vector<1x8x128xf32>
      %363 = vector.broadcast %cst_149 : f32 to vector<1x8x128xf32>
      %364 = arith.select %361, %362, %363 : vector<1x8x128xi1>, vector<1x8x128xf32>
      %cst_150 = arith.constant dense<0.000000e+00> : vector<1x8xf32>
      %365 = vector.multi_reduction <add>, %364, %cst_150 [2] : vector<1x8x128xf32> to vector<1x8xf32>
      %366 = vector.shape_cast %365 : vector<1x8xf32> to vector<1x8x1xf32>
      %cst_151 = arith.constant dense<0.000000e+00> : vector<8x1xf32>
      %367 = vector.multi_reduction <add>, %366, %cst_151 [0] : vector<1x8x1xf32> to vector<8x1xf32>
      %368 = vector.shape_cast %367 : vector<8x1xf32> to vector<1x8x1xf32>
      %369 = arith.addf %331, %368 : vector<1x8x1xf32>
      %cst_152 = arith.constant 1.000000e+00 : f32
      %370 = vector.broadcast %cst_152 : f32 to vector<1x8x1xf32>
      %371 = arith.cmpf olt, %368, %370 : vector<1x8x1xf32>
      %cst_153 = arith.constant 1.000000e+00 : f32
      %cst_154 = arith.constant 0.000000e+00 : f32
      %372 = vector.broadcast %cst_153 : f32 to vector<1x8x1xf32>
      %373 = vector.broadcast %cst_154 : f32 to vector<1x8x1xf32>
      %374 = arith.select %371, %372, %373 : vector<1x8x1xi1>, vector<1x8x1xf32>
      %375 = arith.addf %337, %374 : vector<1x8x1xf32>
      %cst_155 = arith.constant 5.000000e+00 : f32
      %376 = vector.broadcast %cst_155 : f32 to vector<1x8x1xf32>
      %377 = arith.cmpf olt, %368, %376 : vector<1x8x1xf32>
      %cst_156 = arith.constant 1.000000e+00 : f32
      %cst_157 = arith.constant 0.000000e+00 : f32
      %378 = vector.broadcast %cst_156 : f32 to vector<1x8x1xf32>
      %379 = vector.broadcast %cst_157 : f32 to vector<1x8x1xf32>
      %380 = arith.select %377, %378, %379 : vector<1x8x1xi1>, vector<1x8x1xf32>
      %381 = arith.addf %343, %380 : vector<1x8x1xf32>
      %cst_158 = arith.constant 1.000000e+01 : f32
      %382 = vector.broadcast %cst_158 : f32 to vector<1x8x1xf32>
      %383 = arith.cmpf olt, %368, %382 : vector<1x8x1xf32>
      %cst_159 = arith.constant 1.000000e+00 : f32
      %cst_160 = arith.constant 0.000000e+00 : f32
      %384 = vector.broadcast %cst_159 : f32 to vector<1x8x1xf32>
      %385 = vector.broadcast %cst_160 : f32 to vector<1x8x1xf32>
      %386 = arith.select %383, %384, %385 : vector<1x8x1xi1>, vector<1x8x1xf32>
      %387 = arith.addf %349, %386 : vector<1x8x1xf32>
      %c8_i32 = arith.constant 8 : i32
      %388 = vector.broadcast %c8_i32 : i32 to vector<1x8x128xi32>
      %389 = arith.addi %16, %388 : vector<1x8x128xi32>
      %390 = vector.broadcast %14 : vector<1x1x128xi32> to vector<1x8x128xi32>
      %391 = arith.cmpi eq, %390, %389 : vector<1x8x128xi32>
      %cst_161 = arith.constant 0.000000e+00 : f32
      %392 = vector.broadcast %cst_161 : f32 to vector<1x8x128xf32>
      %393 = arith.select %391, %12, %392 : vector<1x8x128xi1>, vector<1x8x128xf32>
      %cst_162 = arith.constant dense<0.000000e+00> : vector<1x8xf32>
      %394 = vector.multi_reduction <add>, %393, %cst_162 [2] : vector<1x8x128xf32> to vector<1x8xf32>
      %395 = vector.shape_cast %394 : vector<1x8xf32> to vector<1x8x1xf32>
      %cst_163 = arith.constant dense<0.000000e+00> : vector<8x1xf32>
      %396 = vector.multi_reduction <add>, %395, %cst_163 [0] : vector<1x8x1xf32> to vector<8x1xf32>
      %397 = vector.shape_cast %396 : vector<8x1xf32> to vector<1x8x1xf32>
      %398 = vector.broadcast %397 : vector<1x8x1xf32> to vector<1x8x128xf32>
      %399 = arith.cmpf ogt, %12, %398 : vector<1x8x128xf32>
      %cst_164 = arith.constant 1.000000e+00 : f32
      %cst_165 = arith.constant 0.000000e+00 : f32
      %400 = vector.broadcast %cst_164 : f32 to vector<1x8x128xf32>
      %401 = vector.broadcast %cst_165 : f32 to vector<1x8x128xf32>
      %402 = arith.select %399, %400, %401 : vector<1x8x128xi1>, vector<1x8x128xf32>
      %cst_166 = arith.constant dense<0.000000e+00> : vector<1x8xf32>
      %403 = vector.multi_reduction <add>, %402, %cst_166 [2] : vector<1x8x128xf32> to vector<1x8xf32>
      %404 = vector.shape_cast %403 : vector<1x8xf32> to vector<1x8x1xf32>
      %cst_167 = arith.constant dense<0.000000e+00> : vector<8x1xf32>
      %405 = vector.multi_reduction <add>, %404, %cst_167 [0] : vector<1x8x1xf32> to vector<8x1xf32>
      %406 = vector.shape_cast %405 : vector<8x1xf32> to vector<1x8x1xf32>
      %407 = arith.addf %369, %406 : vector<1x8x1xf32>
      %cst_168 = arith.constant 1.000000e+00 : f32
      %408 = vector.broadcast %cst_168 : f32 to vector<1x8x1xf32>
      %409 = arith.cmpf olt, %406, %408 : vector<1x8x1xf32>
      %cst_169 = arith.constant 1.000000e+00 : f32
      %cst_170 = arith.constant 0.000000e+00 : f32
      %410 = vector.broadcast %cst_169 : f32 to vector<1x8x1xf32>
      %411 = vector.broadcast %cst_170 : f32 to vector<1x8x1xf32>
      %412 = arith.select %409, %410, %411 : vector<1x8x1xi1>, vector<1x8x1xf32>
      %413 = arith.addf %375, %412 : vector<1x8x1xf32>
      %cst_171 = arith.constant 5.000000e+00 : f32
      %414 = vector.broadcast %cst_171 : f32 to vector<1x8x1xf32>
      %415 = arith.cmpf olt, %406, %414 : vector<1x8x1xf32>
      %cst_172 = arith.constant 1.000000e+00 : f32
      %cst_173 = arith.constant 0.000000e+00 : f32
      %416 = vector.broadcast %cst_172 : f32 to vector<1x8x1xf32>
      %417 = vector.broadcast %cst_173 : f32 to vector<1x8x1xf32>
      %418 = arith.select %415, %416, %417 : vector<1x8x1xi1>, vector<1x8x1xf32>
      %419 = arith.addf %381, %418 : vector<1x8x1xf32>
      %cst_174 = arith.constant 1.000000e+01 : f32
      %420 = vector.broadcast %cst_174 : f32 to vector<1x8x1xf32>
      %421 = arith.cmpf olt, %406, %420 : vector<1x8x1xf32>
      %cst_175 = arith.constant 1.000000e+00 : f32
      %cst_176 = arith.constant 0.000000e+00 : f32
      %422 = vector.broadcast %cst_175 : f32 to vector<1x8x1xf32>
      %423 = vector.broadcast %cst_176 : f32 to vector<1x8x1xf32>
      %424 = arith.select %421, %422, %423 : vector<1x8x1xi1>, vector<1x8x1xf32>
      %425 = arith.addf %387, %424 : vector<1x8x1xf32>
      %c9_i32 = arith.constant 9 : i32
      %426 = vector.broadcast %c9_i32 : i32 to vector<1x8x128xi32>
      %427 = arith.addi %16, %426 : vector<1x8x128xi32>
      %428 = vector.broadcast %14 : vector<1x1x128xi32> to vector<1x8x128xi32>
      %429 = arith.cmpi eq, %428, %427 : vector<1x8x128xi32>
      %cst_177 = arith.constant 0.000000e+00 : f32
      %430 = vector.broadcast %cst_177 : f32 to vector<1x8x128xf32>
      %431 = arith.select %429, %12, %430 : vector<1x8x128xi1>, vector<1x8x128xf32>
      %cst_178 = arith.constant dense<0.000000e+00> : vector<1x8xf32>
      %432 = vector.multi_reduction <add>, %431, %cst_178 [2] : vector<1x8x128xf32> to vector<1x8xf32>
      %433 = vector.shape_cast %432 : vector<1x8xf32> to vector<1x8x1xf32>
      %cst_179 = arith.constant dense<0.000000e+00> : vector<8x1xf32>
      %434 = vector.multi_reduction <add>, %433, %cst_179 [0] : vector<1x8x1xf32> to vector<8x1xf32>
      %435 = vector.shape_cast %434 : vector<8x1xf32> to vector<1x8x1xf32>
      %436 = vector.broadcast %435 : vector<1x8x1xf32> to vector<1x8x128xf32>
      %437 = arith.cmpf ogt, %12, %436 : vector<1x8x128xf32>
      %cst_180 = arith.constant 1.000000e+00 : f32
      %cst_181 = arith.constant 0.000000e+00 : f32
      %438 = vector.broadcast %cst_180 : f32 to vector<1x8x128xf32>
      %439 = vector.broadcast %cst_181 : f32 to vector<1x8x128xf32>
      %440 = arith.select %437, %438, %439 : vector<1x8x128xi1>, vector<1x8x128xf32>
      %cst_182 = arith.constant dense<0.000000e+00> : vector<1x8xf32>
      %441 = vector.multi_reduction <add>, %440, %cst_182 [2] : vector<1x8x128xf32> to vector<1x8xf32>
      %442 = vector.shape_cast %441 : vector<1x8xf32> to vector<1x8x1xf32>
      %cst_183 = arith.constant dense<0.000000e+00> : vector<8x1xf32>
      %443 = vector.multi_reduction <add>, %442, %cst_183 [0] : vector<1x8x1xf32> to vector<8x1xf32>
      %444 = vector.shape_cast %443 : vector<8x1xf32> to vector<1x8x1xf32>
      %445 = arith.addf %407, %444 : vector<1x8x1xf32>
      %cst_184 = arith.constant 1.000000e+00 : f32
      %446 = vector.broadcast %cst_184 : f32 to vector<1x8x1xf32>
      %447 = arith.cmpf olt, %444, %446 : vector<1x8x1xf32>
      %cst_185 = arith.constant 1.000000e+00 : f32
      %cst_186 = arith.constant 0.000000e+00 : f32
      %448 = vector.broadcast %cst_185 : f32 to vector<1x8x1xf32>
      %449 = vector.broadcast %cst_186 : f32 to vector<1x8x1xf32>
      %450 = arith.select %447, %448, %449 : vector<1x8x1xi1>, vector<1x8x1xf32>
      %451 = arith.addf %413, %450 : vector<1x8x1xf32>
      %cst_187 = arith.constant 5.000000e+00 : f32
      %452 = vector.broadcast %cst_187 : f32 to vector<1x8x1xf32>
      %453 = arith.cmpf olt, %444, %452 : vector<1x8x1xf32>
      %cst_188 = arith.constant 1.000000e+00 : f32
      %cst_189 = arith.constant 0.000000e+00 : f32
      %454 = vector.broadcast %cst_188 : f32 to vector<1x8x1xf32>
      %455 = vector.broadcast %cst_189 : f32 to vector<1x8x1xf32>
      %456 = arith.select %453, %454, %455 : vector<1x8x1xi1>, vector<1x8x1xf32>
      %457 = arith.addf %419, %456 : vector<1x8x1xf32>
      %cst_190 = arith.constant 1.000000e+01 : f32
      %458 = vector.broadcast %cst_190 : f32 to vector<1x8x1xf32>
      %459 = arith.cmpf olt, %444, %458 : vector<1x8x1xf32>
      %cst_191 = arith.constant 1.000000e+00 : f32
      %cst_192 = arith.constant 0.000000e+00 : f32
      %460 = vector.broadcast %cst_191 : f32 to vector<1x8x1xf32>
      %461 = vector.broadcast %cst_192 : f32 to vector<1x8x1xf32>
      %462 = arith.select %459, %460, %461 : vector<1x8x1xi1>, vector<1x8x1xf32>
      %463 = arith.addf %425, %462 : vector<1x8x1xf32>
      %c10_i32 = arith.constant 10 : i32
      %464 = vector.broadcast %c10_i32 : i32 to vector<1x8x128xi32>
      %465 = arith.addi %16, %464 : vector<1x8x128xi32>
      %466 = vector.broadcast %14 : vector<1x1x128xi32> to vector<1x8x128xi32>
      %467 = arith.cmpi eq, %466, %465 : vector<1x8x128xi32>
      %cst_193 = arith.constant 0.000000e+00 : f32
      %468 = vector.broadcast %cst_193 : f32 to vector<1x8x128xf32>
      %469 = arith.select %467, %12, %468 : vector<1x8x128xi1>, vector<1x8x128xf32>
      %cst_194 = arith.constant dense<0.000000e+00> : vector<1x8xf32>
      %470 = vector.multi_reduction <add>, %469, %cst_194 [2] : vector<1x8x128xf32> to vector<1x8xf32>
      %471 = vector.shape_cast %470 : vector<1x8xf32> to vector<1x8x1xf32>
      %cst_195 = arith.constant dense<0.000000e+00> : vector<8x1xf32>
      %472 = vector.multi_reduction <add>, %471, %cst_195 [0] : vector<1x8x1xf32> to vector<8x1xf32>
      %473 = vector.shape_cast %472 : vector<8x1xf32> to vector<1x8x1xf32>
      %474 = vector.broadcast %473 : vector<1x8x1xf32> to vector<1x8x128xf32>
      %475 = arith.cmpf ogt, %12, %474 : vector<1x8x128xf32>
      %cst_196 = arith.constant 1.000000e+00 : f32
      %cst_197 = arith.constant 0.000000e+00 : f32
      %476 = vector.broadcast %cst_196 : f32 to vector<1x8x128xf32>
      %477 = vector.broadcast %cst_197 : f32 to vector<1x8x128xf32>
      %478 = arith.select %475, %476, %477 : vector<1x8x128xi1>, vector<1x8x128xf32>
      %cst_198 = arith.constant dense<0.000000e+00> : vector<1x8xf32>
      %479 = vector.multi_reduction <add>, %478, %cst_198 [2] : vector<1x8x128xf32> to vector<1x8xf32>
      %480 = vector.shape_cast %479 : vector<1x8xf32> to vector<1x8x1xf32>
      %cst_199 = arith.constant dense<0.000000e+00> : vector<8x1xf32>
      %481 = vector.multi_reduction <add>, %480, %cst_199 [0] : vector<1x8x1xf32> to vector<8x1xf32>
      %482 = vector.shape_cast %481 : vector<8x1xf32> to vector<1x8x1xf32>
      %483 = arith.addf %445, %482 : vector<1x8x1xf32>
      %cst_200 = arith.constant 1.000000e+00 : f32
      %484 = vector.broadcast %cst_200 : f32 to vector<1x8x1xf32>
      %485 = arith.cmpf olt, %482, %484 : vector<1x8x1xf32>
      %cst_201 = arith.constant 1.000000e+00 : f32
      %cst_202 = arith.constant 0.000000e+00 : f32
      %486 = vector.broadcast %cst_201 : f32 to vector<1x8x1xf32>
      %487 = vector.broadcast %cst_202 : f32 to vector<1x8x1xf32>
      %488 = arith.select %485, %486, %487 : vector<1x8x1xi1>, vector<1x8x1xf32>
      %489 = arith.addf %451, %488 : vector<1x8x1xf32>
      %cst_203 = arith.constant 5.000000e+00 : f32
      %490 = vector.broadcast %cst_203 : f32 to vector<1x8x1xf32>
      %491 = arith.cmpf olt, %482, %490 : vector<1x8x1xf32>
      %cst_204 = arith.constant 1.000000e+00 : f32
      %cst_205 = arith.constant 0.000000e+00 : f32
      %492 = vector.broadcast %cst_204 : f32 to vector<1x8x1xf32>
      %493 = vector.broadcast %cst_205 : f32 to vector<1x8x1xf32>
      %494 = arith.select %491, %492, %493 : vector<1x8x1xi1>, vector<1x8x1xf32>
      %495 = arith.addf %457, %494 : vector<1x8x1xf32>
      %cst_206 = arith.constant 1.000000e+01 : f32
      %496 = vector.broadcast %cst_206 : f32 to vector<1x8x1xf32>
      %497 = arith.cmpf olt, %482, %496 : vector<1x8x1xf32>
      %cst_207 = arith.constant 1.000000e+00 : f32
      %cst_208 = arith.constant 0.000000e+00 : f32
      %498 = vector.broadcast %cst_207 : f32 to vector<1x8x1xf32>
      %499 = vector.broadcast %cst_208 : f32 to vector<1x8x1xf32>
      %500 = arith.select %497, %498, %499 : vector<1x8x1xi1>, vector<1x8x1xf32>
      %501 = arith.addf %463, %500 : vector<1x8x1xf32>
      %c11_i32 = arith.constant 11 : i32
      %502 = vector.broadcast %c11_i32 : i32 to vector<1x8x128xi32>
      %503 = arith.addi %16, %502 : vector<1x8x128xi32>
      %504 = vector.broadcast %14 : vector<1x1x128xi32> to vector<1x8x128xi32>
      %505 = arith.cmpi eq, %504, %503 : vector<1x8x128xi32>
      %cst_209 = arith.constant 0.000000e+00 : f32
      %506 = vector.broadcast %cst_209 : f32 to vector<1x8x128xf32>
      %507 = arith.select %505, %12, %506 : vector<1x8x128xi1>, vector<1x8x128xf32>
      %cst_210 = arith.constant dense<0.000000e+00> : vector<1x8xf32>
      %508 = vector.multi_reduction <add>, %507, %cst_210 [2] : vector<1x8x128xf32> to vector<1x8xf32>
      %509 = vector.shape_cast %508 : vector<1x8xf32> to vector<1x8x1xf32>
      %cst_211 = arith.constant dense<0.000000e+00> : vector<8x1xf32>
      %510 = vector.multi_reduction <add>, %509, %cst_211 [0] : vector<1x8x1xf32> to vector<8x1xf32>
      %511 = vector.shape_cast %510 : vector<8x1xf32> to vector<1x8x1xf32>
      %512 = vector.broadcast %511 : vector<1x8x1xf32> to vector<1x8x128xf32>
      %513 = arith.cmpf ogt, %12, %512 : vector<1x8x128xf32>
      %cst_212 = arith.constant 1.000000e+00 : f32
      %cst_213 = arith.constant 0.000000e+00 : f32
      %514 = vector.broadcast %cst_212 : f32 to vector<1x8x128xf32>
      %515 = vector.broadcast %cst_213 : f32 to vector<1x8x128xf32>
      %516 = arith.select %513, %514, %515 : vector<1x8x128xi1>, vector<1x8x128xf32>
      %cst_214 = arith.constant dense<0.000000e+00> : vector<1x8xf32>
      %517 = vector.multi_reduction <add>, %516, %cst_214 [2] : vector<1x8x128xf32> to vector<1x8xf32>
      %518 = vector.shape_cast %517 : vector<1x8xf32> to vector<1x8x1xf32>
      %cst_215 = arith.constant dense<0.000000e+00> : vector<8x1xf32>
      %519 = vector.multi_reduction <add>, %518, %cst_215 [0] : vector<1x8x1xf32> to vector<8x1xf32>
      %520 = vector.shape_cast %519 : vector<8x1xf32> to vector<1x8x1xf32>
      %521 = arith.addf %483, %520 : vector<1x8x1xf32>
      %cst_216 = arith.constant 1.000000e+00 : f32
      %522 = vector.broadcast %cst_216 : f32 to vector<1x8x1xf32>
      %523 = arith.cmpf olt, %520, %522 : vector<1x8x1xf32>
      %cst_217 = arith.constant 1.000000e+00 : f32
      %cst_218 = arith.constant 0.000000e+00 : f32
      %524 = vector.broadcast %cst_217 : f32 to vector<1x8x1xf32>
      %525 = vector.broadcast %cst_218 : f32 to vector<1x8x1xf32>
      %526 = arith.select %523, %524, %525 : vector<1x8x1xi1>, vector<1x8x1xf32>
      %527 = arith.addf %489, %526 : vector<1x8x1xf32>
      %cst_219 = arith.constant 5.000000e+00 : f32
      %528 = vector.broadcast %cst_219 : f32 to vector<1x8x1xf32>
      %529 = arith.cmpf olt, %520, %528 : vector<1x8x1xf32>
      %cst_220 = arith.constant 1.000000e+00 : f32
      %cst_221 = arith.constant 0.000000e+00 : f32
      %530 = vector.broadcast %cst_220 : f32 to vector<1x8x1xf32>
      %531 = vector.broadcast %cst_221 : f32 to vector<1x8x1xf32>
      %532 = arith.select %529, %530, %531 : vector<1x8x1xi1>, vector<1x8x1xf32>
      %533 = arith.addf %495, %532 : vector<1x8x1xf32>
      %cst_222 = arith.constant 1.000000e+01 : f32
      %534 = vector.broadcast %cst_222 : f32 to vector<1x8x1xf32>
      %535 = arith.cmpf olt, %520, %534 : vector<1x8x1xf32>
      %cst_223 = arith.constant 1.000000e+00 : f32
      %cst_224 = arith.constant 0.000000e+00 : f32
      %536 = vector.broadcast %cst_223 : f32 to vector<1x8x1xf32>
      %537 = vector.broadcast %cst_224 : f32 to vector<1x8x1xf32>
      %538 = arith.select %535, %536, %537 : vector<1x8x1xi1>, vector<1x8x1xf32>
      %539 = arith.addf %501, %538 : vector<1x8x1xf32>
      %c12_i32 = arith.constant 12 : i32
      %540 = vector.broadcast %c12_i32 : i32 to vector<1x8x128xi32>
      %541 = arith.addi %16, %540 : vector<1x8x128xi32>
      %542 = vector.broadcast %14 : vector<1x1x128xi32> to vector<1x8x128xi32>
      %543 = arith.cmpi eq, %542, %541 : vector<1x8x128xi32>
      %cst_225 = arith.constant 0.000000e+00 : f32
      %544 = vector.broadcast %cst_225 : f32 to vector<1x8x128xf32>
      %545 = arith.select %543, %12, %544 : vector<1x8x128xi1>, vector<1x8x128xf32>
      %cst_226 = arith.constant dense<0.000000e+00> : vector<1x8xf32>
      %546 = vector.multi_reduction <add>, %545, %cst_226 [2] : vector<1x8x128xf32> to vector<1x8xf32>
      %547 = vector.shape_cast %546 : vector<1x8xf32> to vector<1x8x1xf32>
      %cst_227 = arith.constant dense<0.000000e+00> : vector<8x1xf32>
      %548 = vector.multi_reduction <add>, %547, %cst_227 [0] : vector<1x8x1xf32> to vector<8x1xf32>
      %549 = vector.shape_cast %548 : vector<8x1xf32> to vector<1x8x1xf32>
      %550 = vector.broadcast %549 : vector<1x8x1xf32> to vector<1x8x128xf32>
      %551 = arith.cmpf ogt, %12, %550 : vector<1x8x128xf32>
      %cst_228 = arith.constant 1.000000e+00 : f32
      %cst_229 = arith.constant 0.000000e+00 : f32
      %552 = vector.broadcast %cst_228 : f32 to vector<1x8x128xf32>
      %553 = vector.broadcast %cst_229 : f32 to vector<1x8x128xf32>
      %554 = arith.select %551, %552, %553 : vector<1x8x128xi1>, vector<1x8x128xf32>
      %cst_230 = arith.constant dense<0.000000e+00> : vector<1x8xf32>
      %555 = vector.multi_reduction <add>, %554, %cst_230 [2] : vector<1x8x128xf32> to vector<1x8xf32>
      %556 = vector.shape_cast %555 : vector<1x8xf32> to vector<1x8x1xf32>
      %cst_231 = arith.constant dense<0.000000e+00> : vector<8x1xf32>
      %557 = vector.multi_reduction <add>, %556, %cst_231 [0] : vector<1x8x1xf32> to vector<8x1xf32>
      %558 = vector.shape_cast %557 : vector<8x1xf32> to vector<1x8x1xf32>
      %559 = arith.addf %521, %558 : vector<1x8x1xf32>
      %cst_232 = arith.constant 1.000000e+00 : f32
      %560 = vector.broadcast %cst_232 : f32 to vector<1x8x1xf32>
      %561 = arith.cmpf olt, %558, %560 : vector<1x8x1xf32>
      %cst_233 = arith.constant 1.000000e+00 : f32
      %cst_234 = arith.constant 0.000000e+00 : f32
      %562 = vector.broadcast %cst_233 : f32 to vector<1x8x1xf32>
      %563 = vector.broadcast %cst_234 : f32 to vector<1x8x1xf32>
      %564 = arith.select %561, %562, %563 : vector<1x8x1xi1>, vector<1x8x1xf32>
      %565 = arith.addf %527, %564 : vector<1x8x1xf32>
      %cst_235 = arith.constant 5.000000e+00 : f32
      %566 = vector.broadcast %cst_235 : f32 to vector<1x8x1xf32>
      %567 = arith.cmpf olt, %558, %566 : vector<1x8x1xf32>
      %cst_236 = arith.constant 1.000000e+00 : f32
      %cst_237 = arith.constant 0.000000e+00 : f32
      %568 = vector.broadcast %cst_236 : f32 to vector<1x8x1xf32>
      %569 = vector.broadcast %cst_237 : f32 to vector<1x8x1xf32>
      %570 = arith.select %567, %568, %569 : vector<1x8x1xi1>, vector<1x8x1xf32>
      %571 = arith.addf %533, %570 : vector<1x8x1xf32>
      %cst_238 = arith.constant 1.000000e+01 : f32
      %572 = vector.broadcast %cst_238 : f32 to vector<1x8x1xf32>
      %573 = arith.cmpf olt, %558, %572 : vector<1x8x1xf32>
      %cst_239 = arith.constant 1.000000e+00 : f32
      %cst_240 = arith.constant 0.000000e+00 : f32
      %574 = vector.broadcast %cst_239 : f32 to vector<1x8x1xf32>
      %575 = vector.broadcast %cst_240 : f32 to vector<1x8x1xf32>
      %576 = arith.select %573, %574, %575 : vector<1x8x1xi1>, vector<1x8x1xf32>
      %577 = arith.addf %539, %576 : vector<1x8x1xf32>
      %c13_i32 = arith.constant 13 : i32
      %578 = vector.broadcast %c13_i32 : i32 to vector<1x8x128xi32>
      %579 = arith.addi %16, %578 : vector<1x8x128xi32>
      %580 = vector.broadcast %14 : vector<1x1x128xi32> to vector<1x8x128xi32>
      %581 = arith.cmpi eq, %580, %579 : vector<1x8x128xi32>
      %cst_241 = arith.constant 0.000000e+00 : f32
      %582 = vector.broadcast %cst_241 : f32 to vector<1x8x128xf32>
      %583 = arith.select %581, %12, %582 : vector<1x8x128xi1>, vector<1x8x128xf32>
      %cst_242 = arith.constant dense<0.000000e+00> : vector<1x8xf32>
      %584 = vector.multi_reduction <add>, %583, %cst_242 [2] : vector<1x8x128xf32> to vector<1x8xf32>
      %585 = vector.shape_cast %584 : vector<1x8xf32> to vector<1x8x1xf32>
      %cst_243 = arith.constant dense<0.000000e+00> : vector<8x1xf32>
      %586 = vector.multi_reduction <add>, %585, %cst_243 [0] : vector<1x8x1xf32> to vector<8x1xf32>
      %587 = vector.shape_cast %586 : vector<8x1xf32> to vector<1x8x1xf32>
      %588 = vector.broadcast %587 : vector<1x8x1xf32> to vector<1x8x128xf32>
      %589 = arith.cmpf ogt, %12, %588 : vector<1x8x128xf32>
      %cst_244 = arith.constant 1.000000e+00 : f32
      %cst_245 = arith.constant 0.000000e+00 : f32
      %590 = vector.broadcast %cst_244 : f32 to vector<1x8x128xf32>
      %591 = vector.broadcast %cst_245 : f32 to vector<1x8x128xf32>
      %592 = arith.select %589, %590, %591 : vector<1x8x128xi1>, vector<1x8x128xf32>
      %cst_246 = arith.constant dense<0.000000e+00> : vector<1x8xf32>
      %593 = vector.multi_reduction <add>, %592, %cst_246 [2] : vector<1x8x128xf32> to vector<1x8xf32>
      %594 = vector.shape_cast %593 : vector<1x8xf32> to vector<1x8x1xf32>
      %cst_247 = arith.constant dense<0.000000e+00> : vector<8x1xf32>
      %595 = vector.multi_reduction <add>, %594, %cst_247 [0] : vector<1x8x1xf32> to vector<8x1xf32>
      %596 = vector.shape_cast %595 : vector<8x1xf32> to vector<1x8x1xf32>
      %597 = arith.addf %559, %596 : vector<1x8x1xf32>
      %cst_248 = arith.constant 1.000000e+00 : f32
      %598 = vector.broadcast %cst_248 : f32 to vector<1x8x1xf32>
      %599 = arith.cmpf olt, %596, %598 : vector<1x8x1xf32>
      %cst_249 = arith.constant 1.000000e+00 : f32
      %cst_250 = arith.constant 0.000000e+00 : f32
      %600 = vector.broadcast %cst_249 : f32 to vector<1x8x1xf32>
      %601 = vector.broadcast %cst_250 : f32 to vector<1x8x1xf32>
      %602 = arith.select %599, %600, %601 : vector<1x8x1xi1>, vector<1x8x1xf32>
      %603 = arith.addf %565, %602 : vector<1x8x1xf32>
      %cst_251 = arith.constant 5.000000e+00 : f32
      %604 = vector.broadcast %cst_251 : f32 to vector<1x8x1xf32>
      %605 = arith.cmpf olt, %596, %604 : vector<1x8x1xf32>
      %cst_252 = arith.constant 1.000000e+00 : f32
      %cst_253 = arith.constant 0.000000e+00 : f32
      %606 = vector.broadcast %cst_252 : f32 to vector<1x8x1xf32>
      %607 = vector.broadcast %cst_253 : f32 to vector<1x8x1xf32>
      %608 = arith.select %605, %606, %607 : vector<1x8x1xi1>, vector<1x8x1xf32>
      %609 = arith.addf %571, %608 : vector<1x8x1xf32>
      %cst_254 = arith.constant 1.000000e+01 : f32
      %610 = vector.broadcast %cst_254 : f32 to vector<1x8x1xf32>
      %611 = arith.cmpf olt, %596, %610 : vector<1x8x1xf32>
      %cst_255 = arith.constant 1.000000e+00 : f32
      %cst_256 = arith.constant 0.000000e+00 : f32
      %612 = vector.broadcast %cst_255 : f32 to vector<1x8x1xf32>
      %613 = vector.broadcast %cst_256 : f32 to vector<1x8x1xf32>
      %614 = arith.select %611, %612, %613 : vector<1x8x1xi1>, vector<1x8x1xf32>
      %615 = arith.addf %577, %614 : vector<1x8x1xf32>
      %c14_i32 = arith.constant 14 : i32
      %616 = vector.broadcast %c14_i32 : i32 to vector<1x8x128xi32>
      %617 = arith.addi %16, %616 : vector<1x8x128xi32>
      %618 = vector.broadcast %14 : vector<1x1x128xi32> to vector<1x8x128xi32>
      %619 = arith.cmpi eq, %618, %617 : vector<1x8x128xi32>
      %cst_257 = arith.constant 0.000000e+00 : f32
      %620 = vector.broadcast %cst_257 : f32 to vector<1x8x128xf32>
      %621 = arith.select %619, %12, %620 : vector<1x8x128xi1>, vector<1x8x128xf32>
      %cst_258 = arith.constant dense<0.000000e+00> : vector<1x8xf32>
      %622 = vector.multi_reduction <add>, %621, %cst_258 [2] : vector<1x8x128xf32> to vector<1x8xf32>
      %623 = vector.shape_cast %622 : vector<1x8xf32> to vector<1x8x1xf32>
      %cst_259 = arith.constant dense<0.000000e+00> : vector<8x1xf32>
      %624 = vector.multi_reduction <add>, %623, %cst_259 [0] : vector<1x8x1xf32> to vector<8x1xf32>
      %625 = vector.shape_cast %624 : vector<8x1xf32> to vector<1x8x1xf32>
      %626 = vector.broadcast %625 : vector<1x8x1xf32> to vector<1x8x128xf32>
      %627 = arith.cmpf ogt, %12, %626 : vector<1x8x128xf32>
      %cst_260 = arith.constant 1.000000e+00 : f32
      %cst_261 = arith.constant 0.000000e+00 : f32
      %628 = vector.broadcast %cst_260 : f32 to vector<1x8x128xf32>
      %629 = vector.broadcast %cst_261 : f32 to vector<1x8x128xf32>
      %630 = arith.select %627, %628, %629 : vector<1x8x128xi1>, vector<1x8x128xf32>
      %cst_262 = arith.constant dense<0.000000e+00> : vector<1x8xf32>
      %631 = vector.multi_reduction <add>, %630, %cst_262 [2] : vector<1x8x128xf32> to vector<1x8xf32>
      %632 = vector.shape_cast %631 : vector<1x8xf32> to vector<1x8x1xf32>
      %cst_263 = arith.constant dense<0.000000e+00> : vector<8x1xf32>
      %633 = vector.multi_reduction <add>, %632, %cst_263 [0] : vector<1x8x1xf32> to vector<8x1xf32>
      %634 = vector.shape_cast %633 : vector<8x1xf32> to vector<1x8x1xf32>
      %635 = arith.addf %597, %634 : vector<1x8x1xf32>
      %cst_264 = arith.constant 1.000000e+00 : f32
      %636 = vector.broadcast %cst_264 : f32 to vector<1x8x1xf32>
      %637 = arith.cmpf olt, %634, %636 : vector<1x8x1xf32>
      %cst_265 = arith.constant 1.000000e+00 : f32
      %cst_266 = arith.constant 0.000000e+00 : f32
      %638 = vector.broadcast %cst_265 : f32 to vector<1x8x1xf32>
      %639 = vector.broadcast %cst_266 : f32 to vector<1x8x1xf32>
      %640 = arith.select %637, %638, %639 : vector<1x8x1xi1>, vector<1x8x1xf32>
      %641 = arith.addf %603, %640 : vector<1x8x1xf32>
      %cst_267 = arith.constant 5.000000e+00 : f32
      %642 = vector.broadcast %cst_267 : f32 to vector<1x8x1xf32>
      %643 = arith.cmpf olt, %634, %642 : vector<1x8x1xf32>
      %cst_268 = arith.constant 1.000000e+00 : f32
      %cst_269 = arith.constant 0.000000e+00 : f32
      %644 = vector.broadcast %cst_268 : f32 to vector<1x8x1xf32>
      %645 = vector.broadcast %cst_269 : f32 to vector<1x8x1xf32>
      %646 = arith.select %643, %644, %645 : vector<1x8x1xi1>, vector<1x8x1xf32>
      %647 = arith.addf %609, %646 : vector<1x8x1xf32>
      %cst_270 = arith.constant 1.000000e+01 : f32
      %648 = vector.broadcast %cst_270 : f32 to vector<1x8x1xf32>
      %649 = arith.cmpf olt, %634, %648 : vector<1x8x1xf32>
      %cst_271 = arith.constant 1.000000e+00 : f32
      %cst_272 = arith.constant 0.000000e+00 : f32
      %650 = vector.broadcast %cst_271 : f32 to vector<1x8x1xf32>
      %651 = vector.broadcast %cst_272 : f32 to vector<1x8x1xf32>
      %652 = arith.select %649, %650, %651 : vector<1x8x1xi1>, vector<1x8x1xf32>
      %653 = arith.addf %615, %652 : vector<1x8x1xf32>
      %c15_i32 = arith.constant 15 : i32
      %654 = vector.broadcast %c15_i32 : i32 to vector<1x8x128xi32>
      %655 = arith.addi %16, %654 : vector<1x8x128xi32>
      %656 = vector.broadcast %14 : vector<1x1x128xi32> to vector<1x8x128xi32>
      %657 = arith.cmpi eq, %656, %655 : vector<1x8x128xi32>
      %cst_273 = arith.constant 0.000000e+00 : f32
      %658 = vector.broadcast %cst_273 : f32 to vector<1x8x128xf32>
      %659 = arith.select %657, %12, %658 : vector<1x8x128xi1>, vector<1x8x128xf32>
      %cst_274 = arith.constant dense<0.000000e+00> : vector<1x8xf32>
      %660 = vector.multi_reduction <add>, %659, %cst_274 [2] : vector<1x8x128xf32> to vector<1x8xf32>
      %661 = vector.shape_cast %660 : vector<1x8xf32> to vector<1x8x1xf32>
      %cst_275 = arith.constant dense<0.000000e+00> : vector<8x1xf32>
      %662 = vector.multi_reduction <add>, %661, %cst_275 [0] : vector<1x8x1xf32> to vector<8x1xf32>
      %663 = vector.shape_cast %662 : vector<8x1xf32> to vector<1x8x1xf32>
      %664 = vector.broadcast %663 : vector<1x8x1xf32> to vector<1x8x128xf32>
      %665 = arith.cmpf ogt, %12, %664 : vector<1x8x128xf32>
      %cst_276 = arith.constant 1.000000e+00 : f32
      %cst_277 = arith.constant 0.000000e+00 : f32
      %666 = vector.broadcast %cst_276 : f32 to vector<1x8x128xf32>
      %667 = vector.broadcast %cst_277 : f32 to vector<1x8x128xf32>
      %668 = arith.select %665, %666, %667 : vector<1x8x128xi1>, vector<1x8x128xf32>
      %cst_278 = arith.constant dense<0.000000e+00> : vector<1x8xf32>
      %669 = vector.multi_reduction <add>, %668, %cst_278 [2] : vector<1x8x128xf32> to vector<1x8xf32>
      %670 = vector.shape_cast %669 : vector<1x8xf32> to vector<1x8x1xf32>
      %cst_279 = arith.constant dense<0.000000e+00> : vector<8x1xf32>
      %671 = vector.multi_reduction <add>, %670, %cst_279 [0] : vector<1x8x1xf32> to vector<8x1xf32>
      %672 = vector.shape_cast %671 : vector<8x1xf32> to vector<1x8x1xf32>
      %673 = arith.addf %635, %672 : vector<1x8x1xf32>
      %cst_280 = arith.constant 1.000000e+00 : f32
      %674 = vector.broadcast %cst_280 : f32 to vector<1x8x1xf32>
      %675 = arith.cmpf olt, %672, %674 : vector<1x8x1xf32>
      %cst_281 = arith.constant 1.000000e+00 : f32
      %cst_282 = arith.constant 0.000000e+00 : f32
      %676 = vector.broadcast %cst_281 : f32 to vector<1x8x1xf32>
      %677 = vector.broadcast %cst_282 : f32 to vector<1x8x1xf32>
      %678 = arith.select %675, %676, %677 : vector<1x8x1xi1>, vector<1x8x1xf32>
      %679 = arith.addf %641, %678 : vector<1x8x1xf32>
      %cst_283 = arith.constant 5.000000e+00 : f32
      %680 = vector.broadcast %cst_283 : f32 to vector<1x8x1xf32>
      %681 = arith.cmpf olt, %672, %680 : vector<1x8x1xf32>
      %cst_284 = arith.constant 1.000000e+00 : f32
      %cst_285 = arith.constant 0.000000e+00 : f32
      %682 = vector.broadcast %cst_284 : f32 to vector<1x8x1xf32>
      %683 = vector.broadcast %cst_285 : f32 to vector<1x8x1xf32>
      %684 = arith.select %681, %682, %683 : vector<1x8x1xi1>, vector<1x8x1xf32>
      %685 = arith.addf %647, %684 : vector<1x8x1xf32>
      %cst_286 = arith.constant 1.000000e+01 : f32
      %686 = vector.broadcast %cst_286 : f32 to vector<1x8x1xf32>
      %687 = arith.cmpf olt, %672, %686 : vector<1x8x1xf32>
      %cst_287 = arith.constant 1.000000e+00 : f32
      %cst_288 = arith.constant 0.000000e+00 : f32
      %688 = vector.broadcast %cst_287 : f32 to vector<1x8x1xf32>
      %689 = vector.broadcast %cst_288 : f32 to vector<1x8x1xf32>
      %690 = arith.select %687, %688, %689 : vector<1x8x1xi1>, vector<1x8x1xf32>
      %691 = arith.addf %653, %690 : vector<1x8x1xf32>
      %cst_289 = arith.constant 6.250000e-02 : f32
      %692 = vector.broadcast %cst_289 : f32 to vector<1x8x1xf32>
      %693 = arith.mulf %673, %692 : vector<1x8x1xf32>
      %694 = vector.shape_cast %693 : vector<1x8x1xf32> to vector<8x1xf32>
      %c0_290 = arith.constant 0 : index
      %c0_291 = arith.constant 0 : index
      %695 = vector.load %arg8[%c0_290, %c0_291] : memref<8x1xf32, #tpu.memory_space<vmem>>, vector<8x1xf32>
      tpu.vector_store %arg8[%c0_290, %c0_291], %694 {strides = array<i32>} : memref<8x1xf32, #tpu.memory_space<vmem>>, vector<8x1xf32>,
      %cst_292 = arith.constant 6.250000e-02 : f32
      %696 = vector.broadcast %cst_292 : f32 to vector<1x8x1xf32>
      %697 = arith.mulf %679, %696 : vector<1x8x1xf32>
      %698 = vector.shape_cast %697 : vector<1x8x1xf32> to vector<8x1xf32>
      %c0_293 = arith.constant 0 : index
      %c0_294 = arith.constant 0 : index
      %699 = vector.load %arg5[%c0_293, %c0_294] : memref<8x1xf32, #tpu.memory_space<vmem>>, vector<8x1xf32>
      tpu.vector_store %arg5[%c0_293, %c0_294], %698 {strides = array<i32>} : memref<8x1xf32, #tpu.memory_space<vmem>>, vector<8x1xf32>,
      %cst_295 = arith.constant 6.250000e-02 : f32
      %700 = vector.broadcast %cst_295 : f32 to vector<1x8x1xf32>
      %701 = arith.mulf %685, %700 : vector<1x8x1xf32>
      %702 = vector.shape_cast %701 : vector<1x8x1xf32> to vector<8x1xf32>
      %c0_296 = arith.constant 0 : index
      %c0_297 = arith.constant 0 : index
      %703 = vector.load %arg6[%c0_296, %c0_297] : memref<8x1xf32, #tpu.memory_space<vmem>>, vector<8x1xf32>
      tpu.vector_store %arg6[%c0_296, %c0_297], %702 {strides = array<i32>} : memref<8x1xf32, #tpu.memory_space<vmem>>, vector<8x1xf32>,
      %cst_298 = arith.constant 6.250000e-02 : f32
      %704 = vector.broadcast %cst_298 : f32 to vector<1x8x1xf32>
      %705 = arith.mulf %691, %704 : vector<1x8x1xf32>
      %706 = vector.shape_cast %705 : vector<1x8x1xf32> to vector<8x1xf32>
      %c0_299 = arith.constant 0 : index
      %c0_300 = arith.constant 0 : index
      %707 = vector.load %arg7[%c0_299, %c0_300] : memref<8x1xf32, #tpu.memory_space<vmem>>, vector<8x1xf32>
      tpu.vector_store %arg7[%c0_299, %c0_300], %706 {strides = array<i32>} : memref<8x1xf32, #tpu.memory_space<vmem>>, vector<8x1xf32>,
    } else {
    }
    return
  }
  func.func @transform_0(%arg0: i32) -> (i32, i32) {
    %c0_i32 = arith.constant 0 : i32
    %c0_i32_0 = arith.constant 0 : i32
    %c0_i32_1 = arith.constant 0 : i32
    return %c0_i32, %c0_i32_0 : i32, i32
  }
  func.func @transform_1(%arg0: i32) -> (i32, i32) {
    %c0_i32 = arith.constant 0 : i32
    %c0_i32_0 = arith.constant 0 : i32
    return %c0_i32, %arg0 : i32, i32
  }
  func.func @transform_2(%arg0: i32) -> (i32, i32, i32) {
    %c0_i32 = arith.constant 0 : i32
    %c0_i32_0 = arith.constant 0 : i32
    %c0_i32_1 = arith.constant 0 : i32
    %c0_i32_2 = arith.constant 0 : i32
    return %c0_i32, %c0_i32_0, %c0_i32_1 : i32, i32, i32
  }
  func.func @transform_3(%arg0: i32) -> (i32, i32) {
    %c0_i32 = arith.constant 0 : i32
    %c0_i32_0 = arith.constant 0 : i32
    %c0_i32_1 = arith.constant 0 : i32
    return %c0_i32, %c0_i32_0 : i32, i32
  }
  func.func @transform_4(%arg0: i32) -> (i32, i32) {
    %c0_i32 = arith.constant 0 : i32
    %c0_i32_0 = arith.constant 0 : i32
    %c0_i32_1 = arith.constant 0 : i32
    return %c0_i32, %c0_i32_0 : i32, i32
  }
  func.func @transform_5(%arg0: i32) -> (i32, i32) {
    %c0_i32 = arith.constant 0 : i32
    %c0_i32_0 = arith.constant 0 : i32
    %c0_i32_1 = arith.constant 0 : i32
    return %c0_i32, %c0_i32_0 : i32, i32
  }
  func.func @transform_6(%arg0: i32) -> (i32, i32) {
    %c0_i32 = arith.constant 0 : i32
    %c0_i32_0 = arith.constant 0 : i32
    %c0_i32_1 = arith.constant 0 : i32
    return %c0_i32, %c0_i32_0 : i32, i32
  }
  func.func @transform_7(%arg0: i32) -> (i32, i32) {
    %c0_i32 = arith.constant 0 : i32
    %c0_i32_0 = arith.constant 0 : i32
    %c0_i32_1 = arith.constant 0 : i32
    return %c0_i32, %c0_i32_0 : i32, i32
  }
}

</mosaic_0001>

<bundles_post_ra>
// kernel: tpu_custom_call.1
= control target key start
LH: loop header
LB: loop body
LE: loop exit
PB: predicated region body
PF: predicated region fallthrough
CT: control target
= control target key end

     0   :  { %13 = vsyncpa [#allocation4], 0  ;;  %s1066_s0 = inlined_call_operand.hbm [shape: bf16[8,256], index: 0, kind: input, shape index: {}]   ;;  %s1067_s1 = inlined_call_operand.hbm [shape: bf16[256,128], index: 1, kind: input, shape index: {}]   ;;  %s1068_s2 = inlined_call_operand.vmem [shape: s32[1,1,128], index: 2, kind: input, shape index: {}]   ;;  %s1069_s3 = inlined_call_operand.vmem [shape: f32[8,1], index: 3, kind: output, shape index: {0}]   ;;  %s1070_s4 = inlined_call_operand.vmem [shape: f32[8,1], index: 4, kind: output, shape index: {1}]   ;;  %s1071_s5 = inlined_call_operand.vmem [shape: f32[8,1], index: 5, kind: output, shape index: {2}]   ;;  %s1072_s6 = inlined_call_operand.vmem [shape: f32[8,1], index: 6, kind: output, shape index: {3}]   ;;  %s1073_s7 = inlined_call_operand.vmem [shape: f32[8,1], index: 7, kind: output, shape index: {4}]  }
   0x1   :  { %14 = vsyncpa [#allocation6], 0  ;;  %s790_s24 = smov [#allocation3]   ;;  %s791_s26 = smov [#allocation5]  }
   0x2   :  { %s21_s25 = sshll.u32 %s790_s24, 4  ;;  %s30_s27 = sshll.u32 %s791_s26, 4  ;;  %s22_s25 = int_to_ptr.vmem [resolvable:$true] %s21_s25  ;;  %s835_s27 = int_to_ptr.vmem [resolvable:$true] %s30_s27 }
   0x3   :  { %s742_s30 = scalar_lea.hbm %s1066_s0, 128 }
   0x4   :  { %p743_p0 = scmp.ne.s32.totalorder %s1066_s0, %s742_s30  ;;  %p746_p1 = scmp.lt.u32.totalorder %s742_s30, %s1066_s0 }
   0x6   :  { %p748_p2 = pnand %p746_p1, %p743_p0 }
   0x8   :  { %751 = shalt.err (!%p748_p2)
}
   0x9   :  { %s752_s12 = scalar_lea.vmem %s22_s25, 128  ;;  %p757_p4 = scmp.lt.s32.totalorder %s22_s25, %s22_s25 }
   0xa   :  { %p753_p3 = scmp.ne.s32.totalorder %s22_s25, %s752_s12  ;;  %p758_p5 = scmp.lt.s32.totalorder %s752_s12, %s752_s12 }
   0xc   :  { %p759_p6 = por %p758_p5, %p757_p4 }
   0xe   :  { %p760_p7 = pnand %p759_p6, %p753_p3 }
  0x10   :  { %763 = shalt.err (!%p760_p7)
}
  0x11   :  { %24 = dma.hbm_to_vmem [thread:$0]  %s1066_s0, 128, %s22_s25, [#allocation4]  }
  0x12   :  { %s764_s17 = scalar_lea.hbm %s1067_s1, 2048 }
  0x13   :  { %p765_p8 = scmp.ne.s32.totalorder %s1067_s1, %s764_s17  ;;  %p768_p9 = scmp.lt.u32.totalorder %s764_s17, %s1067_s1 }
  0x15   :  { %p770_p10 = pnand %p768_p9, %p765_p8 }
  0x17   :  { %773 = shalt.err (!%p770_p10)
}
  0x18   :  { %s774_s22 = scalar_lea.vmem %s835_s27, 2048  ;;  %p779_p12 = scmp.lt.s32.totalorder %s835_s27, %s835_s27 }
  0x19   :  { %p775_p11 = scmp.ne.s32.totalorder %s835_s27, %s774_s22  ;;  %p780_p13 = scmp.lt.s32.totalorder %s774_s22, %s774_s22 }
  0x1b   :  { %p781_p0 = por %p780_p13, %p779_p12 }
  0x1d   :  { %p782_p1 = pnand %p781_p0, %p775_p11 }
  0x1f   :  { %785 = shalt.err (!%p782_p1)
}
  0x20   :  { %s792_s0 = smov 64   ;;  %s793_s23 = smov 4  }
  0x21   :  { %36 = dma.hbm_to_vmem [thread:$0]  %s1067_s1, 2048, %s835_s27, [#allocation6], %s792_s0, %s792_s0, %s793_s23  }
  0x22   :  { %786 = dma.done.wait [#allocation4], 128  }
  0x23   :  { %787 = vsyncadd [#allocation4], 4294967168 }
  0x24   :  { %788 = dma.done.wait [#allocation6], 2048  }
  0x25   :  { %789 = vsyncadd [#allocation6], 4294965248  ;;  %v710_v0 = vld [vmem:[#allocation5 + $0x40] sm:$0xff]   ;;  %v712_v2 = vld [vmem:[#allocation5 + $0x48] sm:$0xff]   ;;  %v231_v19 = vlaneseq  ;;  %v794_v52 = vmov 0.0  }
  0x26   :  { %v711_v1 = vld [vmem:[#allocation5] sm:$0xff]   ;;  %683 = vmatprep.subr.bf16.mxu0 %v710_v0  ;;  %v713_v3 = vld [vmem:[#allocation5 + $0x8] sm:$0xff]   ;;  %v714_v4 = vld [vmem:[#allocation5 + $0x50] sm:$0xff]  }
  0x27   :  { %684 = vmatpush3.bf16.msra.mxu0 %v711_v1  ;;  %v715_v5 = vld [vmem:[#allocation5 + $0x10] sm:$0xff]   ;;  %v716_v6 = vld [vmem:[#allocation5 + $0x58] sm:$0xff]   ;;  %v718_v8 = vld [vmem:[#allocation5 + $0x60] sm:$0xff]   ;;  %v232_v20 = vshrl.u32 %v231_v19, 7 }
  0x28   :  { %685 = vmatprep.subr.bf16.mxu0 %v712_v2  ;;  %v717_v7 = vld [vmem:[#allocation5 + $0x18] sm:$0xff]   ;;  %v719_v9 = vld [vmem:[#allocation5 + $0x20] sm:$0xff]   ;;  %v720_v10 = vld [vmem:[#allocation5 + $0x68] sm:$0xff]  }
  0x29   :  { %v46_v11 = vld [vmem:[#allocation3] sm:$0xff]  ;;  %v721_v13 = vld [vmem:[#allocation5 + $0x28] sm:$0xff]   ;;  %v722_v14 = vld [vmem:[#allocation5 + $0x70] sm:$0xff]   ;;  %v866_v21 = vmul.u32 16, %v232_v20 }
  0x2a   :  { %v665_v12 = vcombine.high %v46_v11, %v46_v11  ;;  %v723_v15 = vld [vmem:[#allocation5 + $0x30] sm:$0xff]   ;;  %v724_v16 = vld [vmem:[#allocation5 + $0x78] sm:$0xff]   ;;  %v664_v18 = vcombine.low %v46_v11, %v46_v11 }
  0x2b   :  { %686 = vmatpush3.bf16.msra.mxu0 %v713_v3  ;;  %v725_v17 = vld [vmem:[#allocation5 + $0x38] sm:$0xff]   ;;  %v319_v28 = vadd.s32 1, %v866_v21  ;;  %v361_v31 = vadd.s32 3, %v866_v21  ;;  %v403_v33 = vadd.s32 5, %v866_v21  ;;  %v445_v35 = vadd.s32 7, %v866_v21 }
  0x2c   :  { %687 = vmatprep.subr.bf16.mxu0 %v714_v4  ;;  %214 = vmatprep.mubr.bf16.mxu0 %v665_v12  ;;  %v871_v23 = vld [vmem:[%s1068_s2] ss:$0 sm:$0xff]  ;;  %v487_v37 = vadd.s32 9, %v866_v21  ;;  %v529_v39 = vadd.s32 11, %v866_v21  ;;  %v571_v41 = vadd.s32 13, %v866_v21  ;;  %v613_v43 = vadd.s32 15, %v866_v21 }
  0x2d   :  { %vm299_vm0 = vcmp.eq.s32.totalorder %v871_v23, %v866_v21  ;;  %vm320_vm1 = vcmp.eq.s32.totalorder %v871_v23, %v319_v28  ;;  %vm362_vm2 = vcmp.eq.s32.totalorder %v871_v23, %v361_v31  ;;  %vm404_vm3 = vcmp.eq.s32.totalorder %v871_v23, %v403_v33 }
  0x2e   :  { %vm446_vm4 = vcmp.eq.s32.totalorder %v871_v23, %v445_v35  ;;  %vm488_vm5 = vcmp.eq.s32.totalorder %v871_v23, %v487_v37  ;;  %vm530_vm6 = vcmp.eq.s32.totalorder %v871_v23, %v529_v39  ;;  %vm572_vm7 = vcmp.eq.s32.totalorder %v871_v23, %v571_v41 }
  0x2f   :  { %688 = vmatpush3.bf16.msra.mxu0 %v715_v5  ;;  %vm614_vm8 = vcmp.eq.s32.totalorder %v871_v23, %v613_v43  ;;  %v240_v12 = vadd.s32 16, %v866_v21  ;;  %vm239_vm13 = vcmp.ge.s32.totalorder %v871_v23, %v866_v21  ;;  %v382_v19 = vadd.s32 4, %v866_v21 }
  0x30   :  { %689 = vmatprep.subr.bf16.mxu0 %v716_v6 }
  0x31   :  { %vm241_vm14 = vcmp.lt.s32.totalorder %v871_v23, %v240_v12 }
  0x32   :  { %vm928_vm15 = vmand %vm239_vm13, %vm241_vm14 }
  0x33   :  { %690 = vmatpush3.bf16.msra.mxu0 %v717_v7 }
  0x34   :  { %691 = vmatprep.subr.bf16.mxu0 %v718_v8 }
  0x37   :  { %692 = vmatpush3.bf16.msra.mxu0 %v719_v9 }
  0x38   :  { %693 = vmatprep.subr.bf16.mxu0 %v720_v10 }
  0x3b   :  { %694 = vmatpush3.bf16.msra.mxu0 %v721_v13 }
  0x3c   :  { %695 = vmatprep.subr.bf16.mxu0 %v722_v14 }
  0x3f   :  { %696 = vmatpush3.bf16.msra.mxu0 %v723_v15  ;;  %v340_v15 = vadd.s32 2, %v866_v21 }
  0x40   :  { %697 = vmatprep.subr.bf16.mxu0 %v724_v16 }
  0x43   :  { %698 = vmatpush3.bf16.msra.mxu0 %v725_v17 }
  0x46   :  { %215 = vmatmul.mubr.bf16.vlgmr.msra.gmra.mrb[0].mxu0 %v664_v18 }
 0x119   :  { %v699_v22 = vpop.f32.mrb[0].mxu0 }
 0x11a   :  { %v700_v24 = vpop.f32.mrb[1].mxu0 }
 0x11b   :  { %v701_v25 = vadd.f32 %v700_v24, %v699_v22  ;;  %v702_v26 = vpop.f32.mrb[2].mxu0  ;;  %v424_v22 = vadd.s32 6, %v866_v21 }
 0x11c   :  { %v703_v27 = vpop.f32.mrb[3].mxu0 }
 0x11d   :  { %v876_v29 = vmul.f32 10.0, %v701_v25  ;;  %v466_v25 = vadd.s32 8, %v866_v21  ;;  %v508_v27 = vadd.s32 10, %v866_v21 }
 0x11f   :  { %243 = vmax.xlane.f32.xlu0 %v876_v29  ;;  %v300_v30 = vsel %vm299_vm0, %v876_v29, 0.0  ;;  %v321_v32 = vsel %vm320_vm1, %v876_v29, 0.0  ;;  %v363_v34 = vsel %vm362_vm2, %v876_v29, 0.0  ;;  %v405_v36 = vsel %vm404_vm3, %v876_v29, 0.0 }
 0x120   :  { %301 = vadd.xlane.f32.xlu1 %v300_v30  ;;  %v447_v38 = vsel %vm446_vm4, %v876_v29, 0.0  ;;  %v489_v40 = vsel %vm488_vm5, %v876_v29, 0.0  ;;  %v531_v42 = vsel %vm530_vm6, %v876_v29, 0.0  ;;  %v573_v44 = vsel %vm572_vm7, %v876_v29, 0.0 }
 0x121   :  { %v615_v45 = vsel %vm614_vm8, %v876_v29, 0.0  ;;  %vm341_vm0 = vcmp.eq.s32.totalorder %v871_v23, %v340_v15  ;;  %vm383_vm1 = vcmp.eq.s32.totalorder %v871_v23, %v382_v19  ;;  %vm425_vm2 = vcmp.eq.s32.totalorder %v871_v23, %v424_v22 }
 0x122   :  { %v342_v20 = vsel %vm341_vm0, %v876_v29, 0.0  ;;  %v384_v24 = vsel %vm383_vm1, %v876_v29, 0.0  ;;  %v426_v26 = vsel %vm425_vm2, %v876_v29, 0.0  ;;  %vm467_vm3 = vcmp.eq.s32.totalorder %v871_v23, %v466_v25 }
 0x123   :  { %v468_v28 = vsel %vm467_vm3, %v876_v29, 0.0  ;;  %vm509_vm4 = vcmp.eq.s32.totalorder %v871_v23, %v508_v27  ;;  %v550_v30 = vadd.s32 12, %v866_v21 }
 0x124   :  { %322 = vadd.xlane.f32.xlu1 %v321_v32  ;;  %v510_v31 = vsel %vm509_vm4, %v876_v29, 0.0  ;;  %v592_v32 = vadd.s32 14, %v866_v21 }
 0x125   :  { %vm551_vm5 = vcmp.eq.s32.totalorder %v871_v23, %v550_v30 }
 0x126   :  { %v552_v33 = vsel %vm551_vm5, %v876_v29, 0.0  ;;  %vm593_vm6 = vcmp.eq.s32.totalorder %v871_v23, %v592_v32 }
 0x128   :  { %364 = vadd.xlane.f32.xlu1 %v363_v34  ;;  %v594_v34 = vsel %vm593_vm6, %v876_v29, 0.0 }
 0x12c   :  { %406 = vadd.xlane.f32.xlu1 %v405_v36 }
 0x130   :  { %448 = vadd.xlane.f32.xlu1 %v447_v38 }
 0x134   :  { %490 = vadd.xlane.f32.xlu1 %v489_v40 }
 0x138   :  { %532 = vadd.xlane.f32.xlu1 %v531_v42 }
 0x13c   :  { %574 = vadd.xlane.f32.xlu1 %v573_v44 }
 0x140   :  { %616 = vadd.xlane.f32.xlu1 %v615_v45 }
 0x1ac   :  { %v903_v46 = vpop.xlane.xlu0 %243 }
 0x1ad   :  { %v905_v47 = vpop.xlane.xlu1 %301  ;;  %v258_v48 = vrot.slane %v903_v46, 4  ;;  %v245_v55 = vsub.f32 %v876_v29, %v903_v46 }
 0x1ae   :  { %vm304_vm7 = vcmp.gt.f32.partialorder %v876_v29, %v905_v47 }
 0x1af   :  { %v259_v49 = vmax.f32 %v903_v46, %v258_v48  ;;  %v246_v60 = vmul.f32 1.442695, %v245_v55  ;;  %v305_v35 = vsel %vm304_vm7, 1.0, %v794_v52 }
 0x1b1   :  { %v323_v50 = vpop.xlane.xlu1 %322  ;;  %v260_v51 = vrot.slane %v259_v49, 2  ;;  %728 = vpow2.f32 %v246_v60 }
 0x1b2   :  { %vm325_vm9 = vcmp.gt.f32.partialorder %v876_v29, %v323_v50 }
 0x1b3   :  { %v326_v53 = vsel %vm325_vm9, 1.0, %v794_v52  ;;  %v261_v54 = vmax.f32 %v259_v49, %v260_v51 }
 0x1b4   :  { %327 = vadd.xlane.f32.xlu1 %v326_v53 }
 0x1b5   :  { %v365_v56 = vpop.xlane.xlu1 %364  ;;  %v262_v57 = vrot.slane %v261_v54, 1 }
 0x1b6   :  { %vm367_vm10 = vcmp.gt.f32.partialorder %v876_v29, %v365_v56 }
 0x1b7   :  { %v368_v58 = vsel %vm367_vm10, 1.0, %v794_v52  ;;  %v263_v59 = vmax.f32 %v261_v54, %v262_v57 }
 0x1b8   :  { %369 = vadd.xlane.f32.xlu1 %v368_v58 }
 0x1b9   :  { %v407_v61 = vpop.xlane.xlu1 %406  ;;  %v264_v62 = vsub.f32 %v903_v46, %v263_v59 }
 0x1ba   :  { %vm409_vm11 = vcmp.gt.f32.partialorder %v876_v29, %v407_v61 }
 0x1bb   :  { %v410_v63 = vsel %vm409_vm11, 1.0, %v794_v52  ;;  %v265_v0 = vmul.f32 1.442695, %v264_v62  ;;  %v920_v3 = vpop.eup %728 }
 0x1bc   :  { %411 = vadd.xlane.f32.xlu1 %v410_v63  ;;  %v251_v56 = vsel %vm928_vm15, %v920_v3, 0.0 }
 0x1bd   :  { %v449_v1 = vpop.xlane.xlu1 %448  ;;  %730 = vpow2.f32 %v265_v0 }
 0x1be   :  { %vm451_vm12 = vcmp.gt.f32.partialorder %v876_v29, %v449_v1 }
 0x1bf   :  { %v452_v2 = vsel %vm451_vm12, 1.0, %v794_v52 }
 0x1c0   :  { %453 = vadd.xlane.f32.xlu1 %v452_v2 }
 0x1c1   :  { %v491_v43 = vpop.xlane.xlu1 %490 }
 0x1c2   :  { %vm493_vm12 = vcmp.gt.f32.partialorder %v876_v29, %v491_v43 }
 0x1c3   :  { %v494_v53 = vsel %vm493_vm12, 1.0, %v794_v52 }
 0x1c5   :  { %v533_v49 = vpop.xlane.xlu1 %532 }
 0x1c6   :  { %vm535_vm14 = vcmp.gt.f32.partialorder %v876_v29, %v533_v49 }
 0x1c7   :  { %v731_v4 = vpop.eup %730  ;;  %v536_v60 = vsel %vm535_vm14, 1.0, %v794_v52 }
 0x1c8   :  { %v267_v5 = vmul.f32 %v731_v4, %v920_v3 }
 0x1c9   :  { %v575_v55 = vpop.xlane.xlu1 %574 }
 0x1ca   :  { %v268_v6 = vrot.slane %v267_v5, 4  ;;  %vm577_vm1 = vcmp.gt.f32.partialorder %v876_v29, %v575_v55 }
 0x1cb   :  { %v578_v63 = vsel %vm577_vm1, 1.0, %v794_v52 }
 0x1cc   :  { %v269_v7 = vadd.f32 %v268_v6, %v267_v5 }
 0x1cd   :  { %v617_v61 = vpop.xlane.xlu1 %616 }
 0x1ce   :  { %v270_v8 = vrot.slane %v269_v7, 2 }
 0x1d0   :  { %v271_v9 = vadd.f32 %v270_v8, %v269_v7 }
 0x1d2   :  { %v272_v10 = vrot.slane %v271_v9, 1 }
 0x1d4   :  { %v273_v11 = vadd.f32 %v272_v10, %v271_v9 }
 0x1d6   :  { %732 = vlog2.f32 %v273_v11 }
 0x1e0   :  { %v733_v13 = vpop.eup %732 }
 0x1e1   :  { %v275_v14 = vmul.f32 0.6931472, %v733_v13 }
 0x1e3   :  { %v276_v16 = vadd.f32 %v275_v14, %v263_v59 }
 0x1e5   :  { %v277_v18 = vsel %vm928_vm15, %v276_v16, -1e+30 }
 0x1e6   :  { %278 = vmax.xlane.f32.xlu0 %v277_v18 }
 0x1ea   :  { %343 = vadd.xlane.f32.xlu0 %v342_v20 }
 0x1ee   :  { %385 = vadd.xlane.f32.xlu0 %v384_v24 }
 0x1f2   :  { %427 = vadd.xlane.f32.xlu0 %v426_v26 }
 0x1f6   :  { %469 = vadd.xlane.f32.xlu0 %v468_v28 }
 0x1fa   :  { %511 = vadd.xlane.f32.xlu0 %v510_v31 }
 0x1fe   :  { %553 = vadd.xlane.f32.xlu0 %v552_v33 }
 0x202   :  { %595 = vadd.xlane.f32.xlu0 %v594_v34 }
 0x206   :  { %306 = vadd.xlane.f32.xlu0 %v305_v35 }
 0x241   :  { %v328_v1 = vpop.xlane.xlu1 %327 }
 0x242   :  { %vm331_vm3 = vcmp.lt.f32.partialorder %v328_v1, 1.0  ;;  %vm334_vm7 = vcmp.lt.f32.partialorder %v328_v1, 5.0 }
 0x243   :  { %v332_v5 = vsel %vm331_vm3, 1.0, %v794_v52  ;;  %v335_v9 = vsel %vm334_vm7, 1.0, %v794_v52 }
 0x245   :  { %v370_v2 = vpop.xlane.xlu1 %369 }
 0x249   :  { %v412_v4 = vpop.xlane.xlu1 %411 }
 0x24a   :  { %vm415_vm12 = vcmp.lt.f32.partialorder %v412_v4, 1.0 }
 0x24b   :  { %v416_v31 = vsel %vm415_vm12, 1.0, %v794_v52 }
 0x24d   :  { %v454_v34 = vpop.xlane.xlu1 %453 }
 0x273   :  { %v279_v36 = vpop.xlane.xlu0 %278 }
 0x274   :  { %v958_v37 = vmax.f32 %v903_v46, %v279_v36 }
 0x276   :  { %v285_v21 = vsub.f32 %v276_v16, %v958_v37 }
 0x277   :  { %v344_v38 = vpop.xlane.xlu0 %343 }
 0x278   :  { %v286_v39 = vmul.f32 1.442695, %v285_v21  ;;  %vm346_vm8 = vcmp.gt.f32.partialorder %v876_v29, %v344_v38 }
 0x279   :  { %v347_v23 = vsel %vm346_vm8, 1.0, %v794_v52  ;;  %vm337_vm8 = vcmp.lt.f32.partialorder %v328_v1, 10.0 }
 0x27a   :  { %348 = vadd.xlane.f32.xlu0 %v347_v23  ;;  %734 = vpow2.f32 %v286_v39  ;;  %v338_v10 = vsel %vm337_vm8, 1.0, %v794_v52 }
 0x27b   :  { %v386_v40 = vpop.xlane.xlu0 %385 }
 0x27c   :  { %vm388_vm9 = vcmp.gt.f32.partialorder %v876_v29, %v386_v40 }
 0x27d   :  { %v389_v41 = vsel %vm388_vm9, 1.0, %v794_v52  ;;  %vm373_vm9 = vcmp.lt.f32.partialorder %v370_v2, 1.0 }
 0x27e   :  { %390 = vadd.xlane.f32.xlu0 %v389_v41  ;;  %v374_v11 = vsel %vm373_vm9, 1.0, %v794_v52  ;;  %vm460_vm9 = vcmp.lt.f32.partialorder %v454_v34, 5.0 }
 0x27f   :  { %v428_v42 = vpop.xlane.xlu0 %427 }
 0x280   :  { %vm430_vm10 = vcmp.gt.f32.partialorder %v876_v29, %v428_v42 }
 0x281   :  { %v431_v44 = vsel %vm430_vm10, 1.0, %v794_v52  ;;  %vm376_vm10 = vcmp.lt.f32.partialorder %v370_v2, 5.0 }
 0x282   :  { %432 = vadd.xlane.f32.xlu0 %v431_v44  ;;  %v377_v12 = vsel %vm376_vm10, 1.0, %v794_v52  ;;  %vm463_vm10 = vcmp.lt.f32.partialorder %v454_v34, 10.0 }
 0x283   :  { %v470_v45 = vpop.xlane.xlu0 %469 }
 0x284   :  { %vm472_vm11 = vcmp.gt.f32.partialorder %v876_v29, %v470_v45  ;;  %v735_v48 = vpop.eup %734 }
 0x285   :  { %v473_v47 = vsel %vm472_vm11, 1.0, %v794_v52  ;;  %v288_v51 = vsel %vm928_vm15, %v735_v48, 0.0  ;;  %vm619_vm15 = vcmp.gt.f32.partialorder %v876_v29, %v617_v61  ;;  %vm379_vm11 = vcmp.lt.f32.partialorder %v370_v2, 10.0 }
 0x286   :  { %248 = vadd.xlane.f32.xlu0 %v920_v3  ;;  %474 = vadd.xlane.f32.xlu1 %v473_v47  ;;  %v620_v0 = vsel %vm619_vm15, 1.0, %v794_v52  ;;  %v380_v30 = vsel %vm379_vm11, 1.0, %v794_v52 }
 0x287   :  { %v512_v50 = vpop.xlane.xlu0 %511 }
 0x288   :  { %vm514_vm13 = vcmp.gt.f32.partialorder %v876_v29, %v512_v50 }
 0x289   :  { %v515_v57 = vsel %vm514_vm13, 1.0, %v794_v52  ;;  %vm418_vm13 = vcmp.lt.f32.partialorder %v412_v4, 5.0 }
 0x28a   :  { %289 = vadd.xlane.f32.xlu0 %v288_v51  ;;  %495 = vadd.xlane.f32.xlu1 %v494_v53  ;;  %v419_v32 = vsel %vm418_vm13, 1.0, %v794_v52 }
 0x28b   :  { %v554_v54 = vpop.xlane.xlu0 %553 }
 0x28c   :  { %vm556_vm0 = vcmp.gt.f32.partialorder %v876_v29, %v554_v54 }
 0x28d   :  { %v557_v59 = vsel %vm556_vm0, 1.0, %v794_v52 }
 0x28e   :  { %252 = vadd.xlane.f32.xlu0 %v251_v56  ;;  %516 = vadd.xlane.f32.xlu1 %v515_v57 }
 0x28f   :  { %v596_v58 = vpop.xlane.xlu0 %595 }
 0x290   :  { %vm598_vm2 = vcmp.gt.f32.partialorder %v876_v29, %v596_v58  ;;  %v281_v29 = vsub.f32 %v903_v46, %v958_v37 }
 0x291   :  { %v599_v62 = vsel %vm598_vm2, 1.0, %v794_v52  ;;  %vm421_vm2 = vcmp.lt.f32.partialorder %v412_v4, 10.0 }
 0x292   :  { %558 = vadd.xlane.f32.xlu1 %v557_v59  ;;  %537 = vadd.xlane.f32.xlu0 %v536_v60  ;;  %v282_v14 = vmul.f32 1.442695, %v281_v29  ;;  %v422_v39 = vsel %vm421_vm2, 1.0, %v794_v52 }
 0x293   :  { %v307_v3 = vpop.xlane.xlu0 %306 }
 0x294   :  { %vm310_vm4 = vcmp.lt.f32.partialorder %v307_v3, 1.0  ;;  %vm313_vm5 = vcmp.lt.f32.partialorder %v307_v3, 5.0  ;;  %vm316_vm6 = vcmp.lt.f32.partialorder %v307_v3, 10.0  ;;  %v330_v13 = vadd.f32 %v328_v1, %v307_v3 }
 0x295   :  { %v311_v6 = vsel %vm310_vm4, 1.0, %v794_v52  ;;  %v314_v7 = vsel %vm313_vm5, 1.0, %v794_v52  ;;  %v317_v8 = vsel %vm316_vm6, 1.0, %v794_v52  ;;  %736 = vpow2.f32 %v282_v14 }
 0x296   :  { %600 = vadd.xlane.f32.xlu1 %v599_v62  ;;  %579 = vadd.xlane.f32.xlu0 %v578_v63  ;;  %v333_v15 = vadd.f32 %v332_v5, %v311_v6  ;;  %v336_v16 = vadd.f32 %v335_v9, %v314_v7  ;;  %v339_v17 = vadd.f32 %v338_v10, %v317_v8  ;;  %vm457_vm5 = vcmp.lt.f32.partialorder %v454_v34, 1.0 }
 0x297   :  { %v458_v61 = vsel %vm457_vm5, 1.0, %v794_v52  ;;  %v464_v1 = vsel %vm463_vm10, 1.0, %v794_v52 }
 0x29a   :  { %621 = vadd.xlane.f32.xlu0 %v620_v0  ;;  %v461_v0 = vsel %vm460_vm9, 1.0, %v794_v52 }
 0x29f   :  { %v737_v63 = vpop.eup %736 }
 0x307   :  { %v349_v18 = vpop.xlane.xlu0 %348 }
 0x308   :  { %v351_v19 = vadd.f32 %v349_v18, %v330_v13  ;;  %vm352_vm14 = vcmp.lt.f32.partialorder %v349_v18, 1.0  ;;  %vm355_vm0 = vcmp.lt.f32.partialorder %v349_v18, 5.0  ;;  %vm358_vm1 = vcmp.lt.f32.partialorder %v349_v18, 10.0 }
 0x309   :  { %v353_v20 = vsel %vm352_vm14, 1.0, %v794_v52  ;;  %v356_v22 = vsel %vm355_vm0, 1.0, %v794_v52  ;;  %v359_v24 = vsel %vm358_vm1, 1.0, %v794_v52 }
 0x30a   :  { %v354_v25 = vadd.f32 %v353_v20, %v333_v15  ;;  %v357_v26 = vadd.f32 %v356_v22, %v336_v16  ;;  %v360_v27 = vadd.f32 %v359_v24, %v339_v17  ;;  %v372_v28 = vadd.f32 %v370_v2, %v351_v19 }
 0x30b   :  { %v391_v33 = vpop.xlane.xlu0 %390 }
 0x30c   :  { %v375_v35 = vadd.f32 %v374_v11, %v354_v25  ;;  %v378_v36 = vadd.f32 %v377_v12, %v357_v26  ;;  %v381_v21 = vadd.f32 %v380_v30, %v360_v27  ;;  %v393_v38 = vadd.f32 %v391_v33, %v372_v28 }
 0x30d   :  { %vm394_vm15 = vcmp.lt.f32.partialorder %v391_v33, 1.0  ;;  %vm397_vm3 = vcmp.lt.f32.partialorder %v391_v33, 5.0  ;;  %vm400_vm4 = vcmp.lt.f32.partialorder %v391_v33, 10.0 }
 0x30e   :  { %v395_v23 = vsel %vm394_vm15, 1.0, %v794_v52  ;;  %v398_v40 = vsel %vm397_vm3, 1.0, %v794_v52  ;;  %v401_v41 = vsel %vm400_vm4, 1.0, %v794_v52  ;;  %v414_v42 = vadd.f32 %v412_v4, %v393_v38 }
 0x30f   :  { %v396_v43 = vadd.f32 %v395_v23, %v375_v35  ;;  %v399_v44 = vadd.f32 %v398_v40, %v378_v36  ;;  %v402_v45 = vadd.f32 %v401_v41, %v381_v21  ;;  %v433_v47 = vpop.xlane.xlu0 %432 }
 0x310   :  { %v435_v48 = vadd.f32 %v433_v47, %v414_v42  ;;  %vm436_vm6 = vcmp.lt.f32.partialorder %v433_v47, 1.0  ;;  %vm439_vm7 = vcmp.lt.f32.partialorder %v433_v47, 5.0  ;;  %vm442_vm8 = vcmp.lt.f32.partialorder %v433_v47, 10.0 }
 0x311   :  { %v417_v49 = vadd.f32 %v416_v31, %v396_v43  ;;  %v420_v50 = vadd.f32 %v419_v32, %v399_v44  ;;  %v423_v51 = vadd.f32 %v422_v39, %v402_v45  ;;  %v437_v53 = vsel %vm436_vm6, 1.0, %v794_v52 }
 0x312   :  { %v440_v54 = vsel %vm439_vm7, 1.0, %v794_v52  ;;  %v443_v55 = vsel %vm442_vm8, 1.0, %v794_v52  ;;  %v456_v62 = vadd.f32 %v454_v34, %v435_v48  ;;  %vm297_vm8 = vcmask 7168  }
 0x313   :  { %v438_v56 = vadd.f32 %v437_v53, %v417_v49  ;;  %v441_v57 = vadd.f32 %v440_v54, %v420_v50  ;;  %v444_v58 = vadd.f32 %v443_v55, %v423_v51  ;;  %v249_v59 = vpop.xlane.xlu0 %248  ;;  %v475_v60 = vpop.xlane.xlu1 %474 }
 0x314   :  { %vm478_vm11 = vcmp.lt.f32.partialorder %v475_v60, 1.0  ;;  %vm481_vm12 = vcmp.lt.f32.partialorder %v475_v60, 5.0  ;;  %v284_v3 = vmul.f32 %v737_v63, %v249_v59  ;;  %vm484_vm13 = vcmp.lt.f32.partialorder %v475_v60, 10.0 }
 0x315   :  { %v459_v2 = vadd.f32 %v458_v61, %v438_v56  ;;  %v462_v4 = vadd.f32 %v461_v0, %v441_v57  ;;  %v479_v29 = vsel %vm478_vm11, 1.0, %v794_v52  ;;  %v465_v5 = vadd.f32 %v464_v1, %v444_v58 }
 0x316   :  { %v482_v6 = vsel %vm481_vm12, 1.0, %v794_v52  ;;  %v477_v9 = vadd.f32 %v475_v60, %v456_v62  ;;  %v485_v10 = vsel %vm484_vm13, 1.0, %v794_v52 }
 0x317   :  { %v290_v7 = vpop.xlane.xlu0 %289  ;;  %v496_v8 = vpop.xlane.xlu1 %495  ;;  %v480_v12 = vadd.f32 %v479_v29, %v459_v2  ;;  %v483_v14 = vadd.f32 %v482_v6, %v462_v4  ;;  %v486_v17 = vadd.f32 %v485_v10, %v465_v5 }
 0x318   :  { %v292_v11 = vadd.f32 %v290_v7, %v284_v3  ;;  %vm499_vm14 = vcmp.lt.f32.partialorder %v496_v8, 1.0  ;;  %vm502_vm0 = vcmp.lt.f32.partialorder %v496_v8, 5.0  ;;  %vm505_vm1 = vcmp.lt.f32.partialorder %v496_v8, 10.0 }
 0x319   :  { %v500_v13 = vsel %vm499_vm14, 1.0, %v794_v52  ;;  %v503_v15 = vsel %vm502_vm0, 1.0, %v794_v52  ;;  %v506_v16 = vsel %vm505_vm1, 1.0, %v794_v52  ;;  %v498_v18 = vadd.f32 %v496_v8, %v477_v9 }
 0x31a   :  { %738 = vlog2.f32 %v292_v11  ;;  %v501_v19 = vadd.f32 %v500_v13, %v480_v12  ;;  %v504_v24 = vadd.f32 %v503_v15, %v483_v14  ;;  %v507_v25 = vadd.f32 %v506_v16, %v486_v17 }
 0x31b   :  { %v253_v20 = vpop.xlane.xlu0 %252  ;;  %v517_v22 = vpop.xlane.xlu1 %516 }
 0x31c   :  { %740 = vlog2.f32 %v253_v20  ;;  %vm520_vm2 = vcmp.lt.f32.partialorder %v517_v22, 1.0  ;;  %vm523_vm15 = vcmp.lt.f32.partialorder %v517_v22, 5.0  ;;  %vm526_vm3 = vcmp.lt.f32.partialorder %v517_v22, 10.0 }
 0x31d   :  { %v521_v26 = vsel %vm520_vm2, 1.0, %v794_v52  ;;  %v524_v27 = vsel %vm523_vm15, 1.0, %v794_v52  ;;  %v519_v28 = vadd.f32 %v517_v22, %v498_v18  ;;  %v527_v30 = vsel %vm526_vm3, 1.0, %v794_v52 }
 0x31e   :  { %v522_v31 = vadd.f32 %v521_v26, %v501_v19  ;;  %v525_v32 = vadd.f32 %v524_v27, %v504_v24  ;;  %v528_v33 = vadd.f32 %v527_v30, %v507_v25 }
 0x31f   :  { %v538_v34 = vpop.xlane.xlu0 %537  ;;  %v559_v35 = vpop.xlane.xlu1 %558 }
 0x320   :  { %v540_v36 = vadd.f32 %v538_v34, %v519_v28  ;;  %vm541_vm4 = vcmp.lt.f32.partialorder %v538_v34, 1.0  ;;  %vm544_vm5 = vcmp.lt.f32.partialorder %v538_v34, 5.0  ;;  %vm547_vm6 = vcmp.lt.f32.partialorder %v538_v34, 10.0 }
 0x321   :  { %v542_v21 = vsel %vm541_vm4, 1.0, %v794_v52  ;;  %v545_v38 = vsel %vm544_vm5, 1.0, %v794_v52  ;;  %v548_v39 = vsel %vm547_vm6, 1.0, %v794_v52  ;;  %vm562_vm7 = vcmp.lt.f32.partialorder %v559_v35, 1.0 }
 0x322   :  { %v543_v23 = vadd.f32 %v542_v21, %v522_v31  ;;  %v546_v40 = vadd.f32 %v545_v38, %v525_v32  ;;  %v549_v41 = vadd.f32 %v548_v39, %v528_v33  ;;  %v561_v42 = vadd.f32 %v559_v35, %v540_v36 }
 0x323   :  { %v563_v43 = vsel %vm562_vm7, 1.0, %v794_v52  ;;  %vm565_vm9 = vcmp.lt.f32.partialorder %v559_v35, 5.0  ;;  %vm568_vm10 = vcmp.lt.f32.partialorder %v559_v35, 10.0  ;;  %v580_v44 = vpop.xlane.xlu0 %579  ;;  %v601_v55 = vpop.xlane.xlu1 %600 }
 0x324   :  { %v739_v45 = vpop.eup %738  ;;  %v564_v47 = vadd.f32 %v563_v43, %v543_v23  ;;  %v566_v48 = vsel %vm565_vm9, 1.0, %v794_v52  ;;  %v569_v49 = vsel %vm568_vm10, 1.0, %v794_v52  ;;  %vm583_vm11 = vcmp.lt.f32.partialorder %v580_v44, 1.0 }
 0x325   :  { %v294_v50 = vmul.f32 0.6931472, %v739_v45  ;;  %v567_v51 = vadd.f32 %v566_v48, %v546_v40  ;;  %v570_v53 = vadd.f32 %v569_v49, %v549_v41  ;;  %v584_v54 = vsel %vm583_vm11, 1.0, %v794_v52 }
 0x326   :  { %v741_v56 = vpop.eup %740  ;;  %vm586_vm12 = vcmp.lt.f32.partialorder %v580_v44, 5.0  ;;  %vm589_vm13 = vcmp.lt.f32.partialorder %v580_v44, 10.0  ;;  %v582_v57 = vadd.f32 %v580_v44, %v561_v42  ;;  %v585_v58 = vadd.f32 %v584_v54, %v564_v47 }
 0x327   :  { %v295_v59 = vadd.f32 %v294_v50, %v958_v37  ;;  %v256_v60 = vmul.f32 0.6931472, %v741_v56  ;;  %v587_v61 = vsel %vm586_vm12, 1.0, %v794_v52  ;;  %v590_v62 = vsel %vm589_vm13, 1.0, %v794_v52  ;;  %v622_v63 = vpop.xlane.xlu0 %621 }
 0x328   :  { %v588_v0 = vadd.f32 %v587_v61, %v567_v51  ;;  %v591_v1 = vadd.f32 %v590_v62, %v570_v53  ;;  %v603_v2 = vadd.f32 %v601_v55, %v582_v57  ;;  %vm604_vm14 = vcmp.lt.f32.partialorder %v601_v55, 1.0 }
 0x329   :  { %v257_v3 = vadd.f32 %v256_v60, %v903_v46  ;;  %v605_v4 = vsel %vm604_vm14, 1.0, %v794_v52  ;;  %vm607_vm0 = vcmp.lt.f32.partialorder %v601_v55, 5.0  ;;  %vm610_vm1 = vcmp.lt.f32.partialorder %v601_v55, 10.0 }
 0x32a   :  { %v606_v29 = vadd.f32 %v605_v4, %v585_v58  ;;  %v608_v5 = vsel %vm607_vm0, 1.0, %v794_v52  ;;  %v611_v37 = vsel %vm610_vm1, 1.0, %v794_v52  ;;  %v624_v6 = vadd.f32 %v622_v63, %v603_v2 }
 0x32b   :  { %v296_v7 = vsub.f32 %v295_v59, %v257_v3  ;;  %v609_v8 = vadd.f32 %v608_v5, %v588_v0  ;;  %v612_v9 = vadd.f32 %v611_v37, %v591_v1  ;;  %vm625_vm2 = vcmp.lt.f32.partialorder %v622_v63, 1.0 }
 0x32c   :  { %v626_v10 = vsel %vm625_vm2, 1.0, %v794_v52  ;;  %vm628_vm15 = vcmp.lt.f32.partialorder %v622_v63, 5.0  ;;  %vm631_vm3 = vcmp.lt.f32.partialorder %v622_v63, 10.0  ;;  %v634_v11 = vmul.f32 0.0625, %v624_v6 }
 0x32d   :  { %298 = vst.msk [vmem:[%s1069_s3] sm:$0xff] %vm297_vm8, %v296_v7  ;;  %v627_v46 = vadd.f32 %v626_v10, %v606_v29  ;;  %v629_v12 = vsel %vm628_vm15, 1.0, %v794_v52  ;;  %v632_v13 = vsel %vm631_vm3, 1.0, %v794_v52 }
 0x32e   :  { %v630_v14 = vadd.f32 %v629_v12, %v609_v8  ;;  %v633_v15 = vadd.f32 %v632_v13, %v612_v9  ;;  %635 = vst.msk [vmem:[%s1073_s7] sm:$0xff] %vm297_vm8, %v634_v11 }
 0x32f   :  { %v636_v16 = vmul.f32 0.0625, %v627_v46 }
 0x330   :  { %v638_v17 = vmul.f32 0.0625, %v630_v14  ;;  %v640_v18 = vmul.f32 0.0625, %v633_v15 }
 0x331   :  { %637 = vst.msk [vmem:[%s1070_s4] sm:$0xff] %vm297_vm8, %v636_v16 }
 0x332   :  { %639 = vst.msk [vmem:[%s1071_s5] sm:$0xff] %vm297_vm8, %v638_v17  ;;  %641 = vst.msk [vmem:[%s1072_s6] sm:$0xff] %vm297_vm8, %v640_v18 }
 0x333   :  { %662 = vsyncpa [#allocation4], 1 }
 0x334   :  { %663 = vsyncpa [#allocation6], 1 }

</bundles_post_ra>
